<compile_context>
chip_gen: v7x
topology: tpu7x:2x2x1
jax: 0.10.0
libtpu: 0.0.40
codegen_flags: <defaults>
</compile_context>

<pallas_src>
import functools

import jax
import jax.numpy as jnp
from jax.experimental import pallas as pl
from jax.experimental.pallas import tpu as pltpu

WBIT = 4                     # weight quantization bits (DoReFa)
ABIT = 4                     # activation quantization bits (DoReFa)
BN_EPS = 1e-5
CONV_PRUNE_AMOUNT = 0.05     # Conv2d_Q default dropout_rate -> prune.ln_structured amount
A_LEVELS = float(2 ** ABIT - 1)
A_INV_LEVELS = 1.0 / A_LEVELS
# 48 MiB scoped VMEM: ample for these tiles, <= v7x's 64 MiB physical, far under
# v5e/v6e's 128 MiB.  (Per-generation tuning could push this higher on v6e.)
VMEM_LIMIT_BYTES = 48 * 1024 * 1024


# ----------------------------- Pallas kernels --------------------------------
def _half_kernel(x_ref, scale_ref, shift_ref, w_ref, sel_ref, act_ref, stats_ref,
                 *, hp):
    """One fused "half" of the block:
         incoming per-lane affine (identity for half 1, bn1 scale/shift for half 2)
      -> 3x3 conv (3 batched lane-dense banded MXU matmuls + XLU sublane rolls)
      -> ReLU6 -> DoReFa activation quantization
      -> global per-channel [sum, sum_sq] accumulation for BatchNorm batch stats.

    All activations live in a flat, row(dy)-padded frame: each image occupies
    hp = H + 2 consecutive rows; rows 0 and hp-1 of every image are zero pads.

    Shapes (per grid step):
      x_ref     : (B_TILE*hp, W*Cin)   bf16  padded-frame input rows
      scale_ref : (1, W*Cin)           f32   incoming affine scale (lane-tiled)
      shift_ref : (1, W*Cin)           f32   incoming affine shift (lane-tiled)
      w_ref     : (3, W*Cin, W*Cout)   bf16  banded conv weights (one per ky tap)
      sel_ref   : (W*Cout, Cout)       f32   lane -> channel one-hot selector
      act_ref   : (B_TILE*hp, W*Cout)  bf16  quantized activation (padded frame)
      stats_ref : (1, 2, Cout)         f32   per-split [sum; sum_sq] accumulator
    """
    m = x_ref.shape[0]                               # B_TILE * hp rows

    # Row-validity mask for the padded frame (pad / garbage rows get zeroed).
    row = jax.lax.broadcasted_iota(jnp.int32, (m, 1), 0) % hp
    valid = jnp.logical_and(row != 0, row != hp - 1)

    # Incoming affine; re-zero the pad rows afterwards so the conv's implicit
    # zero row-padding stays intact (affine would otherwise turn them into `shift`).
    xin = x_ref[...].astype(jnp.float32) * scale_ref[...] + shift_ref[...]
    xin = jnp.where(valid, xin, 0.0).astype(jnp.bfloat16)

    # 3x3 conv: one full-height MXU matmul per ky tap (dx taps and dx zero
    # padding are folded into the banded weights), then align the taps with
    # sublane rolls (XLU) instead of row-shifted slices:
    #   conv[r] = xin[r-1] @ w0 + xin[r] @ w1 + xin[r+1] @ w2
    # which lands the valid conv outputs exactly on rows 1..H of each image's
    # padded frame; rows 0 / hp-1 are garbage and are masked below.
    acc0 = jnp.dot(xin, w_ref[0], preferred_element_type=jnp.float32)
    acc1 = jnp.dot(xin, w_ref[1], preferred_element_type=jnp.float32)
    acc2 = jnp.dot(xin, w_ref[2], preferred_element_type=jnp.float32)
    conv = (pltpu.roll(acc0, 1, 0)               # acc0[r-1]
            + acc1
            + pltpu.roll(acc2, m - 1, 0))        # acc2[r+1]  (positive-shift form of -1)

    # ReLU6 + DoReFa activation quantization (the [0,1] clip subsumes the 6-cap),
    # then zero the pad/garbage rows: keeps the padded-frame invariant for the
    # next kernel and keeps the BN statistics clean.
    a = jnp.clip(conv, 0.0, 1.0)
    a = jnp.round(a * A_LEVELS) * A_INV_LEVELS
    a = jnp.where(valid, a, 0.0)

    # Per-channel stats: channels interleave in the lane dim with period Cout, so
    # reduce lanes -> channels with a single one-hot selector matmul over the
    # stacked [a ; a*a] (two stats matmuls merged), then reduce rows on the XLU.
    stacked = jnp.concatenate([a, a * a], axis=0)                     # (2m, W*Cout)
    ps = jnp.dot(stacked, sel_ref[...], preferred_element_type=jnp.float32)
    s1 = jnp.sum(ps[:m], axis=0, keepdims=True)                       # (1, Cout)
    s2 = jnp.sum(ps[m:], axis=0, keepdims=True)                       # (1, Cout)

    @pl.when(pl.program_id(1) == 0)
    def _():
        stats_ref[...] = jnp.zeros_like(stats_ref)

    stats_ref[...] += jnp.concatenate([s1, s2], axis=0)[None]         # (1, 2, Cout)
    act_ref[...] = a.astype(act_ref.dtype)


def _bn_res_kernel(act_ref, scale_ref, shift_ref, res_ref, o_ref):
    """bn2 affine (scale/shift from global batch stats) + f32 residual add,
    lane-dense on B_TILE images per grid step (padded frame; pad rows are
    cropped by the wrapper)."""
    o_ref[...] = (act_ref[...].astype(jnp.float32) * scale_ref[...]
                  + shift_ref[...] + res_ref[...])


# ----------------------------- pallas_call wrappers ---------------------------
def _choose_tiling(n_imgs, hp, target_rows=256, max_rows=1024):
    """Pick (nsplit, b_tile): nsplit-way batch split (per-split stats slots; lets
    the outer 'parallel' grid axis shard across v7x's 2 TensorCores) and per-step
    image count b_tile so the matmul M dim = b_tile*hp fills the MXU."""
    for nsplit in (2, 1):
        if n_imgs % nsplit:
            continue
        per = n_imgs // nsplit
        cands = [bt for bt in range(1, per + 1)
                 if per % bt == 0 and (bt * hp) % 8 == 0 and bt * hp <= max_rows]
        if not cands:
            if nsplit == 1:
                return 1, n_imgs                 # single full-array block
            continue
        reaching = [bt for bt in cands if bt * hp >= target_rows]
        return nsplit, (min(reaching) if reaching else max(cands))
    return 1, n_imgs


def _half_call(x_flat, scale_l, shift_l, w_banded, sel, *, hp, nsplit, b_tile, cout):
    rows, wci = x_flat.shape
    wco = w_banded.shape[-1]
    mrows = b_tile * hp
    steps = rows // (mrows * nsplit)
    kernel = functools.partial(_half_kernel, hp=hp)
    act, stats = pl.pallas_call(
        kernel,
        out_shape=(jax.ShapeDtypeStruct((rows, wco), jnp.bfloat16),
                   jax.ShapeDtypeStruct((nsplit, 2, cout), jnp.float32)),
        grid=(nsplit, steps),
        in_specs=[
            pl.BlockSpec((mrows, wci), lambda s, j: (s * steps + j, 0)),
            pl.BlockSpec((1, wci), lambda s, j: (0, 0)),
            pl.BlockSpec((1, wci), lambda s, j: (0, 0)),
            # Grid-invariant operands.  At ResNet scale (large W) single-buffer
            # these (pipeline_mode) or tile the W*Cout axis to bound VMEM.
            pl.BlockSpec((3, wci, wco), lambda s, j: (0, 0, 0)),
            pl.BlockSpec((wco, cout), lambda s, j: (0, 0)),
        ],
        out_specs=(
            pl.BlockSpec((mrows, wco), lambda s, j: (s * steps + j, 0)),
            pl.BlockSpec((1, 2, cout), lambda s, j: (s, 0, 0)),   # per-split accumulator
        ),
        compiler_params=pltpu.CompilerParams(
            dimension_semantics=("parallel", "arbitrary"),
            vmem_limit_bytes=VMEM_LIMIT_BYTES),
    )(x_flat, scale_l, shift_l, w_banded, sel)
    return act, jnp.sum(stats, axis=0)


def _bn_res_call(act_flat, scale_l, shift_l, res_flat, mrows):
    rows, wc = act_flat.shape
    n_tiles = rows // mrows
    return pl.pallas_call(
        _bn_res_kernel,
        out_shape=jax.ShapeDtypeStruct((rows, wc), jnp.float32),
        grid=(n_tiles,),
        in_specs=[
            pl.BlockSpec((mrows, wc), lambda i: (i, 0)),
            pl.BlockSpec((1, wc), lambda i: (0, 0)),
            pl.BlockSpec((1, wc), lambda i: (0, 0)),
            pl.BlockSpec((mrows, wc), lambda i: (i, 0)),
        ],
        out_specs=pl.BlockSpec((mrows, wc), lambda i: (i, 0)),
        compiler_params=pltpu.CompilerParams(
            dimension_semantics=("parallel",),
            vmem_limit_bytes=VMEM_LIMIT_BYTES),
    )(act_flat, scale_l, shift_l, res_flat)


# ----------------------------- parameter prep (hoisted) -----------------------
def ln_structured_mask(w, amount):
    # torch.nn.utils.prune.ln_structured(name='weight', amount, n=2, dim=0):
    # zero the round(amount * Cout) output channels with the smallest L2 norm.
    cout = w.shape[0]
    n_prune = int(round(amount * cout))
    if n_prune == 0:
        return jnp.ones_like(w)
    norms = jnp.sqrt(jnp.sum(w.reshape(cout, -1) ** 2, axis=1))
    pruned = jnp.argsort(norms)[:n_prune]
    ch_mask = jnp.ones((cout,), w.dtype).at[pruned].set(0.0)
    return jnp.broadcast_to(ch_mask[:, None, None, None], w.shape)


def dorefa_weight_quantize(w, wbit):
    # Standard DoReFa weight_quantize_fn for 1 < wbit < 32.
    if wbit == 32:
        return w
    levels = 2.0 ** wbit - 1.0
    t = jnp.tanh(w)
    t = t / (2.0 * jnp.max(jnp.abs(t))) + 0.5
    return 2.0 * (jnp.round(t * levels) / levels) - 1.0


def banded_conv_weight(w_oihw, width):
    # (Cout, Cin, 3, 3) -> (3, W*Cin, W*Cout): per-ky banded matrices that fold
    # the dx taps and the dx zero-padding into lane-dense MXU matmuls.
    cout, cin, _, _ = w_oihw.shape
    xi = jnp.arange(width)
    taps = []
    for ky in range(3):
        blk = jnp.zeros((width, cin, width, cout), w_oihw.dtype)
        for kx in range(3):
            shift = (xi[:, None] == (xi[None, :] + kx - 1)).astype(w_oihw.dtype)  # (x_in, x_out)
            wk = jnp.transpose(w_oihw[:, :, ky, kx])                               # (Cin, Cout)
            blk = blk + shift[:, None, :, None] * wk[None, :, None, :]
        taps.append(blk.reshape(width * cin, width * cout))
    return jnp.stack(taps, axis=0)


def prepare_block_params(params, width):
    """Weight-side preprocessing, hoisted out of the per-call hot path: prune
    channel mask -> DoReFa quantization -> banded per-ky bf16 matrices, plus the
    lane->channel selector used for the BN statistics."""
    cout = params["conv1_w"].shape[0]

    def prep_w(w):
        wq = dorefa_weight_quantize(w * ln_structured_mask(w, CONV_PRUNE_AMOUNT), WBIT)
        return banded_conv_weight(wq, width).astype(jnp.bfloat16)

    wco = width * cout
    sel = (jnp.arange(wco)[:, None] % cout ==
           jnp.arange(cout)[None, :]).astype(jnp.float32)
    return {
        "w1": prep_w(params["conv1_w"]),
        "w2": prep_w(params["conv2_w"]),
        "sel": sel,
        "bn1_gamma": params["bn1_gamma"], "bn1_beta": params["bn1_beta"],
        "bn2_gamma": params["bn2_gamma"], "bn2_beta": params["bn2_beta"],
    }


def bn_scale_shift(stats, gamma, beta, count):
    # Training-mode BatchNorm from accumulated sum / sum-of-squares (biased var).
    mean = stats[0] / count
    var = stats[1] / count - mean * mean
    scale = gamma * jax.lax.rsqrt(var + BN_EPS)
    shift = beta - mean * scale
    return scale, shift
    # TODO(synk): running_mean / running_var buffer updates are not materialized.


def _lane_tile(vec, width):
    # per-channel (C,) vector -> (1, width*C) lane vector matching the
    # channel-fastest (w*C + c) lane interleave of the flattened NHWC rows.
    return jnp.tile(vec.astype(jnp.float32), width).reshape(1, -1)


# ----------------------------- block forward ----------------------------------
def preact_basic_block_convq(x_nchw, prep):
    # stride=1, downsample=None (the only configuration in which the reference
    # module is shape-consistent, since bn1 is BatchNorm2d(in_planes)).
    N, Cin, H, W = x_nchw.shape
    wci = W * Cin
    wco = prep["w1"].shape[-1]
    cout = wco // W
    assert wci == wco, "block requires in_planes == out_planes (downsample=None)"
    hp = H + 2
    nsplit, b_tile = _choose_tiling(N, hp)
    mrows = b_tile * hp
    count = float(N * H * W)

    # NCHW -> lane-dense, flat, row(dy)-padded frame (N*hp, W*C).  In a full
    # network these layout transforms live once at the model boundary.
    x_rows = jnp.transpose(x_nchw, (0, 2, 3, 1)).reshape(N, H, wci)
    xpad = jnp.pad(x_rows, ((0, 0), (1, 1), (0, 0))).reshape(N * hp, wci)  # f32 residual
    x_bf = xpad.astype(jnp.bfloat16)

    one_l = jnp.ones((1, wci), jnp.float32)
    zero_l = jnp.zeros((1, wci), jnp.float32)

    # half 1: conv1 -> relu6 -> act_q            (+ bn1 batch stats)
    act1, stats1 = _half_call(x_bf, one_l, zero_l, prep["w1"], prep["sel"],
                              hp=hp, nsplit=nsplit, b_tile=b_tile, cout=cout)
    sc1, sh1 = bn_scale_shift(stats1, prep["bn1_gamma"], prep["bn1_beta"], count)

    # half 2: bn1 affine (fused) -> conv2 -> relu6 -> act_q   (+ bn2 batch stats)
    act2, stats2 = _half_call(act1, _lane_tile(sc1, W), _lane_tile(sh1, W),
                              prep["w2"], prep["sel"],
                              hp=hp, nsplit=nsplit, b_tile=b_tile, cout=cout)
    sc2, sh2 = bn_scale_shift(stats2, prep["bn2_gamma"], prep["bn2_beta"], count)

    # bn2 affine + f32 residual add, then crop the pad rows and restore NCHW.
    out_flat = _bn_res_call(act2, _lane_tile(sc2, W), _lane_tile(sh2, W), xpad, mrows)
    out = out_flat.reshape(N, hp, W, cout)[:, 1:H + 1]
    return jnp.transpose(out, (0, 3, 1, 2))


# ----------------------------- pure-JAX reference (self-check) ----------------
def reference_block(x, params):
    """Mirrors the kernel's numerics (bf16 MXU operands / stored activations,
    f32 accumulation and stats) using XLA convolutions."""
    def prep_w(w):
        wq = dorefa_weight_quantize(w * ln_structured_mask(w, CONV_PRUNE_AMOUNT), WBIT)
        return wq.astype(jnp.bfloat16)

    def conv(v_bf16, w_bf16):
        return jax.lax.conv_general_dilated(
            v_bf16, w_bf16, window_strides=(1, 1), padding=((1, 1), (1, 1)),
            dimension_numbers=("NCHW", "OIHW", "NCHW"),
            preferred_element_type=jnp.float32)

    def act_q(v):
        return jnp.round(jnp.clip(v, 0.0, 1.0) * A_LEVELS) * A_INV_LEVELS

    def bn_affine(a, gamma, beta):
        mean = jnp.mean(a, axis=(0, 2, 3))
        var = jnp.mean(a * a, axis=(0, 2, 3)) - mean * mean
        sc = gamma * jax.lax.rsqrt(var + BN_EPS)
        sh = beta - mean * sc
        return sc[None, :, None, None], sh[None, :, None, None]

    w1 = prep_w(params["conv1_w"])
    w2 = prep_w(params["conv2_w"])
    a1 = act_q(conv(x.astype(jnp.bfloat16), w1))
    sc1, sh1 = bn_affine(a1, params["bn1_gamma"], params["bn1_beta"])
    h1 = a1.astype(jnp.bfloat16).astype(jnp.float32) * sc1 + sh1   # act1 is stored bf16
    a2 = act_q(conv(h1.astype(jnp.bfloat16), w2))
    sc2, sh2 = bn_affine(a2, params["bn2_gamma"], params["bn2_beta"])
    return a2.astype(jnp.bfloat16).astype(jnp.float32) * sc2 + sh2 + x


# ----------------------------- main -------------------------------------------
if __name__ == "__main__":
    key = jax.random.PRNGKey(0)
    k_x, k_w1, k_w2 = jax.random.split(key, 3)

    # batch=16, in_planes=out_planes=8, 16x16 spatial -> lane-dense W*C = 128,
    # B_TILE=8 images per grid step (matmul M = 144), 2-way parallel batch split.
    N, C, H, W = 16, 8, 16, 16
    in_planes = out_planes = C

    x = jax.random.normal(k_x, (N, C, H, W), jnp.float32)
    params = {
        "conv1_w": 0.1 * jax.random.normal(k_w1, (out_planes, in_planes, 3, 3), jnp.float32),
        "conv2_w": 0.1 * jax.random.normal(k_w2, (out_planes, out_planes, 3, 3), jnp.float32),
        # BatchNorm2d default init: weight=1, bias=0
        "bn1_gamma": jnp.ones((out_planes,), jnp.float32),
        "bn1_beta": jnp.zeros((out_planes,), jnp.float32),
        "bn2_gamma": jnp.ones((out_planes,), jnp.float32),
        "bn2_beta": jnp.zeros((out_planes,), jnp.float32),
    }

    prep = prepare_block_params(params, W)           # hoisted out of the hot path
    out = jax.jit(preact_basic_block_convq)(x, prep)
    out = jax.block_until_ready(out)

    assert out.shape == (N, out_planes, H, W), out.shape
    assert bool(jnp.all(jnp.isfinite(out)))

    # Self-check against a numerics-mirroring XLA reference.  bf16 operands and
    # quantization rounding near level boundaries can flip isolated elements, so
    # check the fraction of large deviations rather than exact equality.
    ref = reference_block(x, params)
    diff = jnp.abs(out - ref)
    bad_frac = float(jnp.mean((diff > 0.1).astype(jnp.float32)))
    assert bad_frac < 0.02, (bad_frac, float(jnp.max(diff)))

    print("KERNEL_OK")
</pallas_src>

<mosaic_0001>
module attributes {stable_mosaic.version = 11 : i64} {
  func.func @_half_kernel(%arg0: i32, %arg1: i32, %arg2: memref<144x128xbf16, #tpu.memory_space<vmem>>, %arg3: memref<1x128xf32, #tpu.memory_space<vmem>>, %arg4: memref<1x128xf32, #tpu.memory_space<vmem>>, %arg5: memref<3x128x128xbf16, #tpu.memory_space<vmem>>, %arg6: memref<128x8xf32, #tpu.memory_space<vmem>>, %arg7: memref<144x128xbf16, #tpu.memory_space<vmem>>, %arg8: memref<1x2x8xf32, #tpu.memory_space<vmem>>) attributes {dimension_semantics = [#tpu.dimension_semantics<parallel>, #tpu.dimension_semantics<arbitrary>], iteration_bounds = array<i64: 2, 1>, scalar_prefetch = 0 : i64, scratch_operands = 0 : i64, tpu.core_type = #tpu.core_type<tc>, window_params = [{transform_indices = @transform_0, window_bounds = array<i64: 144, 128>}, {pipeline_mode = #tpu.pipeline_mode<synchronous>, transform_indices = @transform_1, window_bounds = array<i64: 1, 128>}, {pipeline_mode = #tpu.pipeline_mode<synchronous>, transform_indices = @transform_2, window_bounds = array<i64: 1, 128>}, {pipeline_mode = #tpu.pipeline_mode<synchronous>, transform_indices = @transform_3, window_bounds = array<i64: 3, 128, 128>}, {pipeline_mode = #tpu.pipeline_mode<synchronous>, transform_indices = @transform_4, window_bounds = array<i64: 128, 8>}, {transform_indices = @transform_5, window_bounds = array<i64: 144, 128>}, {transform_indices = @transform_6, window_bounds = array<i64: 1, 2, 8>}]} {
    %0 = tpu.iota {dimensions = array<i32: 0>} : vector<144x1xi32>
    %c18_i32 = arith.constant 18 : i32
    %c0_i32 = arith.constant 0 : i32
    %1 = arith.cmpi eq, %c18_i32, %c0_i32 : i32
    %c1_i32 = arith.constant 1 : i32
    %2 = arith.select %1, %c1_i32, %c18_i32 : i32
    %3 = vector.broadcast %2 : i32 to vector<144x1xi32>
    %4 = arith.remsi %0, %3 : vector<144x1xi32>
    %c0_i32_0 = arith.constant 0 : i32
    %5 = vector.broadcast %c0_i32_0 : i32 to vector<144x1xi32>
    %6 = arith.cmpi ne, %4, %5 : vector<144x1xi32>
    %c0_i32_1 = arith.constant 0 : i32
    %7 = vector.broadcast %c0_i32_1 : i32 to vector<144x1xi32>
    %8 = arith.cmpi slt, %4, %7 : vector<144x1xi32>
    %c0_i32_2 = arith.constant 0 : i32
    %9 = arith.cmpi slt, %2, %c0_i32_2 : i32
    %10 = vector.broadcast %9 : i1 to vector<144x1xi1>
    %11 = vector.broadcast %10 : vector<144x1xi1> to vector<144x1xi1>
    %12 = arith.xori %8, %11 : vector<144x1xi1>
    %13 = arith.andi %12, %6 : vector<144x1xi1>
    %14 = vector.broadcast %2 : i32 to vector<144x1xi32>
    %15 = arith.addi %4, %14 : vector<144x1xi32>
    %16 = arith.select %13, %15, %4 : vector<144x1xi1>, vector<144x1xi32>
    %c0_i32_3 = arith.constant 0 : i32
    %17 = vector.broadcast %c0_i32_3 : i32 to vector<144x1xi32>
    %18 = arith.cmpi ne, %16, %17 : vector<144x1xi32>
    %c17_i32 = arith.constant 17 : i32
    %19 = vector.broadcast %c17_i32 : i32 to vector<144x1xi32>
    %20 = arith.cmpi ne, %16, %19 : vector<144x1xi32>
    %21 = arith.andi %18, %20 : vector<144x1xi1>
    %c0 = arith.constant 0 : index
    %c0_4 = arith.constant 0 : index
    %22 = vector.load %arg2[%c0, %c0_4] : memref<144x128xbf16, #tpu.memory_space<vmem>>, vector<144x128xbf16>
    %23 = arith.extf %22 : vector<144x128xbf16> to vector<144x128xf32>
    %c0_5 = arith.constant 0 : index
    %c0_6 = arith.constant 0 : index
    %24 = vector.load %arg3[%c0_5, %c0_6] : memref<1x128xf32, #tpu.memory_space<vmem>>, vector<1x128xf32>
    %25 = vector.broadcast %24 : vector<1x128xf32> to vector<144x128xf32>
    %26 = arith.mulf %23, %25 : vector<144x128xf32>
    %c0_7 = arith.constant 0 : index
    %c0_8 = arith.constant 0 : index
    %27 = vector.load %arg4[%c0_7, %c0_8] : memref<1x128xf32, #tpu.memory_space<vmem>>, vector<1x128xf32>
    %28 = vector.broadcast %27 : vector<1x128xf32> to vector<144x128xf32>
    %29 = arith.addf %26, %28 : vector<144x128xf32>
    %cst = arith.constant 0.000000e+00 : f32
    %30 = vector.shape_cast %21 : vector<144x1xi1> to vector<144x1xi1>
    %31 = vector.broadcast %30 : vector<144x1xi1> to vector<144x128xi1>
    %32 = vector.broadcast %cst : f32 to vector<144x128xf32>
    %33 = arith.select %31, %29, %32 : vector<144x128xi1>, vector<144x128xf32>
    %34 = arith.truncf %33 : vector<144x128xf32> to vector<144x128xbf16>
    %c0_9 = arith.constant 0 : index
    %c0_10 = arith.constant 0 : index
    %c0_11 = arith.constant 0 : index
    %35 = vector.load %arg5[%c0_9, %c0_10, %c0_11] : memref<3x128x128xbf16, #tpu.memory_space<vmem>>, vector<1x128x128xbf16>
    %36 = vector.shape_cast %35 : vector<1x128x128xbf16> to vector<128x128xbf16>
    %cst_12 = arith.constant dense<0.000000e+00> : vector<144x128xf32>
    %37 = tpu.matmul %34, %36, %cst_12 {dimension_numbers = #tpu.dot_dimension_numbers<[1], [0], [0], [1], [0, 0, 1, 1], [], []>} : vector<144x128xbf16>, vector<128x128xbf16>, vector<144x128xf32> -> vector<144x128xf32>
    %c1 = arith.constant 1 : index
    %c0_13 = arith.constant 0 : index
    %c0_14 = arith.constant 0 : index
    %38 = vector.load %arg5[%c1, %c0_13, %c0_14] : memref<3x128x128xbf16, #tpu.memory_space<vmem>>, vector<1x128x128xbf16>
    %39 = vector.shape_cast %38 : vector<1x128x128xbf16> to vector<128x128xbf16>
    %cst_15 = arith.constant dense<0.000000e+00> : vector<144x128xf32>
    %40 = tpu.matmul %34, %39, %cst_15 {dimension_numbers = #tpu.dot_dimension_numbers<[1], [0], [0], [1], [0, 0, 1, 1], [], []>} : vector<144x128xbf16>, vector<128x128xbf16>, vector<144x128xf32> -> vector<144x128xf32>
    %c2 = arith.constant 2 : index
    %c0_16 = arith.constant 0 : index
    %c0_17 = arith.constant 0 : index
    %41 = vector.load %arg5[%c2, %c0_16, %c0_17] : memref<3x128x128xbf16, #tpu.memory_space<vmem>>, vector<1x128x128xbf16>
    %42 = vector.shape_cast %41 : vector<1x128x128xbf16> to vector<128x128xbf16>
    %cst_18 = arith.constant dense<0.000000e+00> : vector<144x128xf32>
    %43 = tpu.matmul %34, %42, %cst_18 {dimension_numbers = #tpu.dot_dimension_numbers<[1], [0], [0], [1], [0, 0, 1, 1], [], []>} : vector<144x128xbf16>, vector<128x128xbf16>, vector<144x128xf32> -> vector<144x128xf32>
    %c1_i32_19 = arith.constant 1 : i32
    %44 = tpu.dynamic_rotate %37 by %c1_i32_19 dim 0 : vector<144x128xf32>, i32 -> vector<144x128xf32>
    %45 = arith.addf %44, %40 : vector<144x128xf32>
    %c143_i32 = arith.constant 143 : i32
    %46 = tpu.dynamic_rotate %43 by %c143_i32 dim 0 : vector<144x128xf32>, i32 -> vector<144x128xf32>
    %47 = arith.addf %45, %46 : vector<144x128xf32>
    %cst_20 = arith.constant 0.000000e+00 : f32
    %cst_21 = arith.constant 1.000000e+00 : f32
    %48 = vector.broadcast %cst_20 : f32 to vector<144x128xf32>
    %49 = arith.maximumf %48, %47 : vector<144x128xf32>
    %50 = vector.broadcast %cst_21 : f32 to vector<144x128xf32>
    %51 = arith.minimumf %50, %49 : vector<144x128xf32>
    %cst_22 = arith.constant 1.500000e+01 : f32
    %52 = vector.broadcast %cst_22 : f32 to vector<144x128xf32>
    %53 = arith.mulf %51, %52 : vector<144x128xf32>
    %54 = math.roundeven %53 : vector<144x128xf32>
    %cst_23 = arith.constant 0.0666666701 : f32
    %55 = vector.broadcast %cst_23 : f32 to vector<144x128xf32>
    %56 = arith.mulf %54, %55 : vector<144x128xf32>
    %cst_24 = arith.constant 0.000000e+00 : f32
    %57 = vector.shape_cast %21 : vector<144x1xi1> to vector<144x1xi1>
    %58 = vector.broadcast %57 : vector<144x1xi1> to vector<144x128xi1>
    %59 = vector.broadcast %cst_24 : f32 to vector<144x128xf32>
    %60 = arith.select %58, %56, %59 : vector<144x128xi1>, vector<144x128xf32>
    %61 = arith.mulf %60, %60 : vector<144x128xf32>
    %62 = tpu.concatenate %60, %61 in 0 : vector<144x128xf32>, vector<144x128xf32> -> vector<288x128xf32>
    %c0_25 = arith.constant 0 : index
    %c0_26 = arith.constant 0 : index
    %63 = vector.load %arg6[%c0_25, %c0_26] : memref<128x8xf32, #tpu.memory_space<vmem>>, vector<128x8xf32>
    %cst_27 = arith.constant dense<0.000000e+00> : vector<288x8xf32>
    %64 = tpu.matmul %62, %63, %cst_27 {dimension_numbers = #tpu.dot_dimension_numbers<[1], [0], [0], [1], [0, 0, 1, 1], [], []>} : vector<288x128xf32>, vector<128x8xf32>, vector<288x8xf32> -> vector<288x8xf32>
    %65 = vector.extract_strided_slice %64 {offsets = [0, 0], sizes = [144, 8], strides = [1, 1]} : vector<288x8xf32> to vector<144x8xf32>
    %cst_28 = arith.constant dense<0.000000e+00> : vector<8xf32>
    %66 = vector.multi_reduction <add>, %65, %cst_28 [0] : vector<144x8xf32> to vector<8xf32>
    %67 = vector.shape_cast %66 : vector<8xf32> to vector<1x8xf32>
    %68 = vector.extract_strided_slice %64 {offsets = [144, 0], sizes = [144, 8], strides = [1, 1]} : vector<288x8xf32> to vector<144x8xf32>
    %cst_29 = arith.constant dense<0.000000e+00> : vector<8xf32>
    %69 = vector.multi_reduction <add>, %68, %cst_29 [0] : vector<144x8xf32> to vector<8xf32>
    %70 = vector.shape_cast %69 : vector<8xf32> to vector<1x8xf32>
    %c0_i32_30 = arith.constant 0 : i32
    %71 = arith.cmpi eq, %arg1, %c0_i32_30 : i32
    %72 = arith.extui %71 : i1 to i32
    %c0_i32_31 = arith.constant 0 : i32
    %73 = arith.cmpi ne, %72, %c0_i32_31 : i32
    scf.if %73 {
      %cst_40 = arith.constant 0.000000e+00 : f32
      %81 = vector.broadcast %cst_40 : f32 to vector<1x2x8xf32>
      %c0_41 = arith.constant 0 : index
      %c0_42 = arith.constant 0 : index
      %c0_43 = arith.constant 0 : index
      %82 = vector.load %arg8[%c0_41, %c0_42, %c0_43] : memref<1x2x8xf32, #tpu.memory_space<vmem>>, vector<1x2x8xf32>
      tpu.vector_store %arg8[%c0_41, %c0_42, %c0_43], %81 {strides = array<i32>} : memref<1x2x8xf32, #tpu.memory_space<vmem>>, vector<1x2x8xf32>,
    } else {
    }
    %c0_32 = arith.constant 0 : index
    %c0_33 = arith.constant 0 : index
    %c0_34 = arith.constant 0 : index
    %74 = vector.load %arg8[%c0_32, %c0_33, %c0_34] : memref<1x2x8xf32, #tpu.memory_space<vmem>>, vector<1x2x8xf32>
    %75 = tpu.concatenate %67, %70 in 0 : vector<1x8xf32>, vector<1x8xf32> -> vector<2x8xf32>
    %76 = vector.shape_cast %75 : vector<2x8xf32> to vector<1x2x8xf32>
    %77 = arith.addf %74, %76 : vector<1x2x8xf32>
    %c0_35 = arith.constant 0 : index
    %c0_36 = arith.constant 0 : index
    %c0_37 = arith.constant 0 : index
    %78 = vector.load %arg8[%c0_35, %c0_36, %c0_37] : memref<1x2x8xf32, #tpu.memory_space<vmem>>, vector<1x2x8xf32>
    tpu.vector_store %arg8[%c0_35, %c0_36, %c0_37], %77 {strides = array<i32>} : memref<1x2x8xf32, #tpu.memory_space<vmem>>, vector<1x2x8xf32>,
    %79 = arith.truncf %60 : vector<144x128xf32> to vector<144x128xbf16>
    %c0_38 = arith.constant 0 : index
    %c0_39 = arith.constant 0 : index
    %80 = vector.load %arg7[%c0_38, %c0_39] : memref<144x128xbf16, #tpu.memory_space<vmem>>, vector<144x128xbf16>
    tpu.vector_store %arg7[%c0_38, %c0_39], %79 {strides = array<i32>} : memref<144x128xbf16, #tpu.memory_space<vmem>>, vector<144x128xbf16>,
    return
  }
  func.func @transform_0(%arg0: i32, %arg1: i32) -> (i32, i32) {
    %c1_i32 = arith.constant 1 : i32
    %0 = arith.muli %arg0, %c1_i32 : i32
    %1 = arith.addi %0, %arg1 : i32
    %c0_i32 = arith.constant 0 : i32
    %c0_i32_0 = arith.constant 0 : i32
    return %1, %c0_i32 : i32, i32
  }
  func.func @transform_1(%arg0: i32, %arg1: i32) -> (i32, i32) {
    %c0_i32 = arith.constant 0 : i32
    %c0_i32_0 = arith.constant 0 : i32
    %c0_i32_1 = arith.constant 0 : i32
    return %c0_i32, %c0_i32_0 : i32, i32
  }
  func.func @transform_2(%arg0: i32, %arg1: i32) -> (i32, i32) {
    %c0_i32 = arith.constant 0 : i32
    %c0_i32_0 = arith.constant 0 : i32
    %c0_i32_1 = arith.constant 0 : i32
    return %c0_i32, %c0_i32_0 : i32, i32
  }
  func.func @transform_3(%arg0: i32, %arg1: i32) -> (i32, i32, i32) {
    %c0_i32 = arith.constant 0 : i32
    %c0_i32_0 = arith.constant 0 : i32
    %c0_i32_1 = arith.constant 0 : i32
    %c0_i32_2 = arith.constant 0 : i32
    return %c0_i32, %c0_i32_0, %c0_i32_1 : i32, i32, i32
  }
  func.func @transform_4(%arg0: i32, %arg1: i32) -> (i32, i32) {
    %c0_i32 = arith.constant 0 : i32
    %c0_i32_0 = arith.constant 0 : i32
    %c0_i32_1 = arith.constant 0 : i32
    return %c0_i32, %c0_i32_0 : i32, i32
  }
  func.func @transform_5(%arg0: i32, %arg1: i32) -> (i32, i32) {
    %c1_i32 = arith.constant 1 : i32
    %0 = arith.muli %arg0, %c1_i32 : i32
    %1 = arith.addi %0, %arg1 : i32
    %c0_i32 = arith.constant 0 : i32
    %c0_i32_0 = arith.constant 0 : i32
    return %1, %c0_i32 : i32, i32
  }
  func.func @transform_6(%arg0: i32, %arg1: i32) -> (i32, i32, i32) {
    %c0_i32 = arith.constant 0 : i32
    %c0_i32_0 = arith.constant 0 : i32
    %c0_i32_1 = arith.constant 0 : i32
    return %arg0, %c0_i32, %c0_i32_0 : i32, i32, i32
  }
}

module attributes {stable_mosaic.version = 11 : i64} {
  func.func @_bn_res_kernel(%arg0: i32, %arg1: memref<144x128xbf16, #tpu.memory_space<vmem>>, %arg2: memref<1x128xf32, #tpu.memory_space<vmem>>, %arg3: memref<1x128xf32, #tpu.memory_space<vmem>>, %arg4: memref<144x128xf32, #tpu.memory_space<vmem>>, %arg5: memref<144x128xf32, #tpu.memory_space<vmem>>) attributes {dimension_semantics = [#tpu.dimension_semantics<parallel>], iteration_bounds = array<i64: 2>, scalar_prefetch = 0 : i64, scratch_operands = 0 : i64, tpu.core_type = #tpu.core_type<tc>, window_params = [{transform_indices = @transform_0, window_bounds = array<i64: 144, 128>}, {pipeline_mode = #tpu.pipeline_mode<synchronous>, transform_indices = @transform_1, window_bounds = array<i64: 1, 128>}, {pipeline_mode = #tpu.pipeline_mode<synchronous>, transform_indices = @transform_2, window_bounds = array<i64: 1, 128>}, {transform_indices = @transform_3, window_bounds = array<i64: 144, 128>}, {transform_indices = @transform_4, window_bounds = array<i64: 144, 128>}]} {
    %c0 = arith.constant 0 : index
    %c0_0 = arith.constant 0 : index
    %0 = vector.load %arg1[%c0, %c0_0] : memref<144x128xbf16, #tpu.memory_space<vmem>>, vector<144x128xbf16>
    %1 = arith.extf %0 : vector<144x128xbf16> to vector<144x128xf32>
    %c0_1 = arith.constant 0 : index
    %c0_2 = arith.constant 0 : index
    %2 = vector.load %arg2[%c0_1, %c0_2] : memref<1x128xf32, #tpu.memory_space<vmem>>, vector<1x128xf32>
    %3 = vector.broadcast %2 : vector<1x128xf32> to vector<144x128xf32>
    %4 = arith.mulf %1, %3 : vector<144x128xf32>
    %c0_3 = arith.constant 0 : index
    %c0_4 = arith.constant 0 : index
    %5 = vector.load %arg3[%c0_3, %c0_4] : memref<1x128xf32, #tpu.memory_space<vmem>>, vector<1x128xf32>
    %6 = vector.broadcast %5 : vector<1x128xf32> to vector<144x128xf32>
    %7 = arith.addf %4, %6 : vector<144x128xf32>
    %c0_5 = arith.constant 0 : index
    %c0_6 = arith.constant 0 : index
    %8 = vector.load %arg4[%c0_5, %c0_6] : memref<144x128xf32, #tpu.memory_space<vmem>>, vector<144x128xf32>
    %9 = arith.addf %7, %8 : vector<144x128xf32>
    %c0_7 = arith.constant 0 : index
    %c0_8 = arith.constant 0 : index
    %10 = vector.load %arg5[%c0_7, %c0_8] : memref<144x128xf32, #tpu.memory_space<vmem>>, vector<144x128xf32>
    tpu.vector_store %arg5[%c0_7, %c0_8], %9 {strides = array<i32>} : memref<144x128xf32, #tpu.memory_space<vmem>>, vector<144x128xf32>,
    return
  }
  func.func @transform_0(%arg0: i32) -> (i32, i32) {
    %c0_i32 = arith.constant 0 : i32
    %c0_i32_0 = arith.constant 0 : i32
    return %arg0, %c0_i32 : i32, i32
  }
  func.func @transform_1(%arg0: i32) -> (i32, i32) {
    %c0_i32 = arith.constant 0 : i32
    %c0_i32_0 = arith.constant 0 : i32
    %c0_i32_1 = arith.constant 0 : i32
    return %c0_i32, %c0_i32_0 : i32, i32
  }
  func.func @transform_2(%arg0: i32) -> (i32, i32) {
    %c0_i32 = arith.constant 0 : i32
    %c0_i32_0 = arith.constant 0 : i32
    %c0_i32_1 = arith.constant 0 : i32
    return %c0_i32, %c0_i32_0 : i32, i32
  }
  func.func @transform_3(%arg0: i32) -> (i32, i32) {
    %c0_i32 = arith.constant 0 : i32
    %c0_i32_0 = arith.constant 0 : i32
    return %arg0, %c0_i32 : i32, i32
  }
  func.func @transform_4(%arg0: i32) -> (i32, i32) {
    %c0_i32 = arith.constant 0 : i32
    %c0_i32_0 = arith.constant 0 : i32
    return %arg0, %c0_i32 : i32, i32
  }
}

</mosaic_0001>

<bundles_post_ra>
// kernel: tile.28
= control target key start
LH: loop header
LB: loop body
LE: loop exit
PB: predicated region body
PF: predicated region fallthrough
CT: control target
= control target key end

     0   :  { %s28_s0 = inlined_call_operand.vmem [shape: f32[8], index: 0, kind: input, shape index: {}]   ;;  %s29_s1 = inlined_call_operand.vmem [shape: f32[16,8], index: 1, kind: output, shape index: {}]  }
   0x1   :  { %v4_v0 = vld [vmem:[%s28_s0] ss:$0 sm:$0xff] }
   0x2   :  { %5 = vst [vmem:[%s29_s1] sm:$0xff] %v4_v0  ;;  %8 = vst [vmem:[%s29_s1 + $0x8] sm:$0xff] %v4_v0 }

// kernel: tile.29
= control target key start
LH: loop header
LB: loop body
LE: loop exit
PB: predicated region body
PF: predicated region fallthrough
CT: control target
= control target key end

     0   :  { %s131_s10 = smov 120   ;;  %s132_s11 = smov 104   ;;  %vm3_vm0 = vcmask 64512   ;;  %vm9_vm1 = vcmask 1048512   ;;  %vm15_vm2 = vcmask 982912   ;;  %vm21_vm3 = vcmask 917312   ;;  %s207_s0 = inlined_call_operand.vmem [shape: f32[16,8], index: 0, kind: input, shape index: {}]   ;;  %s208_s1 = inlined_call_operand.vmem [shape: f32[1,128], index: 1, kind: output, shape index: {}]  }
   0x1   :  { %v101_v0 = vld [vmem:[%s207_s0 + $0xf] sm:$0x1]   ;;  %v103_v1 = vld [vmem:[%s207_s0 + $0xd] sm:$0x1]   ;;  %v102_v2 = vld [vmem:[%s207_s0 + $0xe] sm:$0x1]  }
   0x2   :  { %7 = vrot.lane.b32.xlu0 %v101_v0, %s131_s10  ;;  %19 = vrot.lane.b32.xlu1 %v103_v1, %s132_s11  ;;  %v104_v3 = vld [vmem:[%s207_s0 + $0xc] sm:$0x1]   ;;  %s133_s16 = smov 112   ;;  %s134_s17 = smov 96   ;;  %v105_v4 = vld [vmem:[%s207_s0 + $0xb] sm:$0x1]  }
   0x3   :  { %v106_v5 = vld [vmem:[%s207_s0 + $0xa] sm:$0x1]   ;;  %v2_v6 = vld [vmem:[%s207_s0] sm:$0x1]   ;;  %s135_s24 = smov 88   ;;  %s136_s25 = smov 80  }
   0x4   :  { %4 = vst.msk [vmem:[#allocation0] sm:$0x1] %vm3_vm0, %v2_v6   ;;  %v107_v7 = vld [vmem:[%s207_s0 + $0x9] sm:$0x1]   ;;  %v108_v8 = vld [vmem:[%s207_s0 + $0x8] sm:$0x1]  }
   0x5   :  { %s137_s30 = smov 72   ;;  %s138_s2 = smov 64   ;;  %v109_v9 = vld [vmem:[%s207_s0 + $0x7] sm:$0x1]   ;;  %v110_v10 = vld [vmem:[%s207_s0 + $0x6] sm:$0x1]  }
   0x6   :  { %13 = vrot.lane.b32.xlu0 %v102_v2, %s133_s16  ;;  %25 = vrot.lane.b32.xlu1 %v104_v3, %s134_s17  ;;  %s139_s7 = smov 56   ;;  %s140_s8 = smov 48   ;;  %v111_v11 = vld [vmem:[%s207_s0 + $0x5] sm:$0x1]   ;;  %v112_v12 = vld [vmem:[%s207_s0 + $0x4] sm:$0x1]  }
   0x7   :  { %s141_s13 = smov 40   ;;  %s142_s14 = smov 32   ;;  %v113_v13 = vld [vmem:[%s207_s0 + $0x3] sm:$0x1]   ;;  %v114_v14 = vld [vmem:[%s207_s0 + $0x2] sm:$0x1]  }
   0x8   :  { %s143_s19 = smov 24   ;;  %s144_s20 = smov 16   ;;  %v115_v15 = vld [vmem:[%s207_s0 + $0x1] sm:$0x1]   ;;  %vm27_vm4 = vcmask 851712   ;;  %vm33_vm5 = vcmask 786112  }
   0x9   :  { %s145_s0 = smov 8   ;;  %vm39_vm6 = vcmask 720512   ;;  %vm45_vm7 = vcmask 654912   ;;  %vm51_vm8 = vcmask 589312   ;;  %vm57_vm9 = vcmask 523712  }
   0xa   :  { %31 = vrot.lane.b32.xlu0 %v105_v4, %s135_s24  ;;  %37 = vrot.lane.b32.xlu1 %v106_v5, %s136_s25  ;;  %vm63_vm10 = vcmask 458112   ;;  %vm69_vm11 = vcmask 392512   ;;  %vm75_vm12 = vcmask 326912   ;;  %vm81_vm13 = vcmask 261312  }
   0xb   :  { %vm87_vm14 = vcmask 195712   ;;  %vm93_vm15 = vcmask 130112  }
   0xe   :  { %43 = vrot.lane.b32.xlu0 %v107_v7, %s137_s30  ;;  %49 = vrot.lane.b32.xlu1 %v108_v8, %s138_s2 }
  0x12   :  { %55 = vrot.lane.b32.xlu0 %v109_v9, %s139_s7  ;;  %61 = vrot.lane.b32.xlu1 %v110_v10, %s140_s8 }
  0x16   :  { %67 = vrot.lane.b32.xlu0 %v111_v11, %s141_s13  ;;  %73 = vrot.lane.b32.xlu1 %v112_v12, %s142_s14 }
  0x1a   :  { %79 = vrot.lane.b32.xlu0 %v113_v13, %s143_s19  ;;  %85 = vrot.lane.b32.xlu1 %v114_v14, %s144_s20 }
  0x1e   :  { %91 = vrot.lane.b32.xlu0 %v115_v15, %s145_s0 }
  0x74   :  { %v8_v16 = vpop.permute.xlu0 %7   ;;  %v20_v17 = vpop.permute.xlu1 %19  }
  0x75   :  { %10 = vst.msk [vmem:[#allocation0] sm:$0x1] %vm9_vm1, %v8_v16  }
  0x78   :  { %v14_v18 = vpop.permute.xlu0 %13   ;;  %v26_v19 = vpop.permute.xlu1 %25  }
  0x79   :  { %16 = vst.msk [vmem:[#allocation0] sm:$0x1] %vm15_vm2, %v14_v18  }
  0x7a   :  { %22 = vst.msk [vmem:[#allocation0] sm:$0x1] %vm21_vm3, %v20_v17  }
  0x7b   :  { %28 = vst.msk [vmem:[#allocation0] sm:$0x1] %vm27_vm4, %v26_v19  }
  0x7c   :  { %v32_v20 = vpop.permute.xlu0 %31   ;;  %v38_v21 = vpop.permute.xlu1 %37  }
  0x7d   :  { %34 = vst.msk [vmem:[#allocation0] sm:$0x1] %vm33_vm5, %v32_v20  }
  0x7e   :  { %40 = vst.msk [vmem:[#allocation0] sm:$0x1] %vm39_vm6, %v38_v21  }
  0x80   :  { %v44_v22 = vpop.permute.xlu0 %43   ;;  %v50_v23 = vpop.permute.xlu1 %49  }
  0x81   :  { %46 = vst.msk [vmem:[#allocation0] sm:$0x1] %vm45_vm7, %v44_v22  }
  0x82   :  { %52 = vst.msk [vmem:[#allocation0] sm:$0x1] %vm51_vm8, %v50_v23  }
  0x84   :  { %v56_v24 = vpop.permute.xlu0 %55   ;;  %v62_v25 = vpop.permute.xlu1 %61  }
  0x85   :  { %58 = vst.msk [vmem:[#allocation0] sm:$0x1] %vm57_vm9, %v56_v24  }
  0x86   :  { %64 = vst.msk [vmem:[#allocation0] sm:$0x1] %vm63_vm10, %v62_v25  }
  0x88   :  { %v68_v26 = vpop.permute.xlu0 %67   ;;  %v74_v27 = vpop.permute.xlu1 %73  }
  0x89   :  { %70 = vst.msk [vmem:[#allocation0] sm:$0x1] %vm69_vm11, %v68_v26  }
  0x8a   :  { %76 = vst.msk [vmem:[#allocation0] sm:$0x1] %vm75_vm12, %v74_v27  }
  0x8c   :  { %v80_v28 = vpop.permute.xlu0 %79   ;;  %v86_v29 = vpop.permute.xlu1 %85  }
  0x8d   :  { %82 = vst.msk [vmem:[#allocation0] sm:$0x1] %vm81_vm13, %v80_v28  }
  0x8e   :  { %88 = vst.msk [vmem:[#allocation0] sm:$0x1] %vm87_vm14, %v86_v29  }
  0x90   :  { %v92_v30 = vpop.permute.xlu0 %91  }
  0x91   :  { %94 = vst.msk [vmem:[#allocation0] sm:$0x1] %vm93_vm15, %v92_v30  }
  0x98   :  { %v98_v31 = vld [vmem:[#allocation0] sm:$0x1] }
  0x99   :  { %100 = vst [vmem:[%s208_s1] sm:$0x1] %v98_v31 }

// kernel: preact_basic_block_convq.5
= control target key start
LH: loop header
LB: loop body
LE: loop exit
PB: predicated region body
PF: predicated region fallthrough
CT: control target
= control target key end

     0   :  { %s528_s15 = smov 0   ;;  %s653_s0 = inlined_call_operand.vmem [shape: bf16[288,128], index: 0, kind: input, shape index: {}]   ;;  %s654_s1 = inlined_call_operand.vmem [shape: f32[1,128], index: 1, kind: input, shape index: {}]   ;;  %s655_s2 = inlined_call_operand.vmem [shape: f32[1,128], index: 2, kind: input, shape index: {}]   ;;  %s656_s3 = inlined_call_operand.vmem [shape: f32[288,128], index: 3, kind: input, shape index: {}]   ;;  %s657_s4 = inlined_call_operand.vmem [shape: f32[288,128], index: 4, kind: output, shape index: {}]  }
   0x1 LB: > { %s431_s16 = sadd.s32 4294967295, %s501_s15   ;;  %p435_p0 = scmp.ge.s32.totalorder %s501_s15, 1  ;;  %s501_s15 = sphi %s528_s15, %s14_s15  }
   0x2   : > { %p174_p1 = scmp.lt.s32.totalorder %s501_s15, 3 }
   0x4   : > { %p175_p2 = pnand %p435_p0, %p174_p1 }
   0x5   : > { %s205_s17 = smul.u32 (!%p175_p2), 18, %s431_s16  ;;  %v549_v1 = vld [vmem:[%s654_s1] ss:$0 sm:$0xff] (!%p175_p2) }
   0x6   : > { %178 = sbr.rel (%p175_p2) target bundleno = 41 (0x29), region = 36  ;;  %v562_v5 = vld [vmem:[%s655_s2] ss:$0 sm:$0xff] (!%p175_p2) }
   0x7   : > { %p206_p3 = scmp.lt.s32.totalorder (!%p175_p2), %s205_s17, 35 }
   0xd   : > { %s659_s17 = smov (!%p206_p3, %s205_s17), 35 }
   0xe   : > { %s436_s18 = sshll.u32 %s659_s17, 2  ;;  %s437_s19 = sshll.u32 %s659_s17, 3 }
   0xf   : > { %s543_s22 = scalar_lea.vmem %s653_s0, %s436_s18  ;;  %s556_s27 = scalar_lea.vmem %s656_s3, %s437_s19 }
  0x10   : > { %v444_v0 = vld [vmem:[%s543_s22] sm:$0xff]   ;;  %v479_v4 = vld [vmem:[%s543_s22 + $0x8] sm:$0xff]   ;;  %v480_v8 = vld [vmem:[%s543_s22 + $0x10] sm:$0xff]   ;;  %s583_s6 = scalar_lea.vmem %s657_s4, %s437_s19 }
  0x11   : > { %v445_v2 = vunpack.c.l.bf16 %v444_v0  ;;  %v446_v3 = vunpack.c.h.bf16 %v444_v0  ;;  %v449_v6 = vunpack.c.l.bf16 %v479_v4  ;;  %v450_v7 = vunpack.c.h.bf16 %v479_v4  ;;  %v481_v13 = vld [vmem:[%s543_s22 + $0x18] sm:$0xff]   ;;  %v309_v14 = vld [vmem:[%s556_s27] sm:$0xff]  ;;  %v310_v15 = vld [vmem:[%s556_s27 + $0x8] sm:$0xff] }
  0x12   : > { %v453_v11 = vunpack.c.l.bf16 %v480_v8  ;;  %v454_v12 = vunpack.c.h.bf16 %v480_v8  ;;  %v457_v18 = vunpack.c.l.bf16 %v481_v13  ;;  %v458_v19 = vunpack.c.h.bf16 %v481_v13  ;;  %v311_v22 = vld [vmem:[%s556_s27 + $0x10] sm:$0xff]  ;;  %v312_v23 = vld [vmem:[%s556_s27 + $0x18] sm:$0xff]  ;;  %v313_v28 = vld [vmem:[%s556_s27 + $0x20] sm:$0xff] }
  0x13   : > { %v266_v9 = vmul.f32 %v445_v2, %v549_v1  ;;  %v267_v10 = vmul.f32 %v446_v3, %v549_v1  ;;  %v268_v16 = vmul.f32 %v449_v6, %v549_v1  ;;  %v269_v17 = vmul.f32 %v450_v7, %v549_v1  ;;  %v314_v29 = vld [vmem:[%s556_s27 + $0x28] sm:$0xff]  ;;  %v482_v32 = vld [vmem:[%s543_s22 + $0x20] sm:$0xff]   ;;  %v315_v37 = vld [vmem:[%s556_s27 + $0x30] sm:$0xff] }
  0x14   : > { %v270_v24 = vmul.f32 %v453_v11, %v549_v1  ;;  %v271_v25 = vmul.f32 %v454_v12, %v549_v1  ;;  %v272_v30 = vmul.f32 %v457_v18, %v549_v1  ;;  %v273_v31 = vmul.f32 %v458_v19, %v549_v1  ;;  %v316_v38 = vld [vmem:[%s556_s27 + $0x38] sm:$0xff]  ;;  %v483_v39 = vld [vmem:[%s543_s22 + $0x28] sm:$0xff]   ;;  %v484_v44 = vld [vmem:[%s543_s22 + $0x30] sm:$0xff]  }
  0x15   : > { %v291_v20 = vadd.f32 %v562_v5, %v266_v9  ;;  %v292_v21 = vadd.f32 %v562_v5, %v267_v10  ;;  %v293_v26 = vadd.f32 %v562_v5, %v268_v16  ;;  %v294_v27 = vadd.f32 %v562_v5, %v269_v17  ;;  %v485_v49 = vld [vmem:[%s543_s22 + $0x38] sm:$0xff]   ;;  %v317_v58 = vld [vmem:[%s556_s27 + $0x40] sm:$0xff]  ;;  %v318_v59 = vld [vmem:[%s556_s27 + $0x48] sm:$0xff] }
  0x16   : > { %v295_v35 = vadd.f32 %v562_v5, %v270_v24  ;;  %v296_v36 = vadd.f32 %v562_v5, %v271_v25  ;;  %v297_v42 = vadd.f32 %v562_v5, %v272_v30  ;;  %v298_v43 = vadd.f32 %v562_v5, %v273_v31  ;;  %v319_v3 = vld [vmem:[%s556_s27 + $0x50] sm:$0xff]  ;;  %v320_v4 = vld [vmem:[%s556_s27 + $0x58] sm:$0xff]  ;;  %v321_v10 = vld [vmem:[%s556_s27 + $0x60] sm:$0xff] }
  0x17   : > { %v327_v33 = vadd.f32 %v309_v14, %v291_v20  ;;  %v328_v34 = vadd.f32 %v310_v15, %v292_v21  ;;  %v329_v40 = vadd.f32 %v311_v22, %v293_v26  ;;  %v330_v41 = vadd.f32 %v312_v23, %v294_v27  ;;  %v322_v11 = vld [vmem:[%s556_s27 + $0x68] sm:$0xff]  ;;  %v486_v14 = vld [vmem:[%s543_s22 + $0x40] sm:$0xff]   ;;  %v323_v19 = vld [vmem:[%s556_s27 + $0x70] sm:$0xff] }
  0x18   : > { %v331_v45 = vadd.f32 %v313_v28, %v295_v35  ;;  %v332_v46 = vadd.f32 %v314_v29, %v296_v36  ;;  %v461_v47 = vunpack.c.l.bf16 %v482_v32  ;;  %v462_v48 = vunpack.c.h.bf16 %v482_v32  ;;  %v324_v20 = vld [vmem:[%s556_s27 + $0x78] sm:$0xff] }
  0x19   : > { %345 = vst [vmem:[%s583_s6] sm:$0xff] %v327_v33  ;;  %346 = vst [vmem:[%s583_s6 + $0x8] sm:$0xff] %v328_v34  ;;  %v333_v50 = vadd.f32 %v315_v37, %v297_v42  ;;  %v334_v51 = vadd.f32 %v316_v38, %v298_v43  ;;  %v465_v52 = vunpack.c.l.bf16 %v483_v39  ;;  %v466_v53 = vunpack.c.h.bf16 %v483_v39  ;;  %v325_v33 = vld [vmem:[%s556_s27 + $0x80] sm:$0xff]  ;;  %v326_v34 = vld [vmem:[%s556_s27 + $0x88] sm:$0xff] }
  0x1a   : > { %347 = vst [vmem:[%s583_s6 + $0x10] sm:$0xff] %v329_v40  ;;  %348 = vst [vmem:[%s583_s6 + $0x18] sm:$0xff] %v330_v41  ;;  %v274_v54 = vmul.f32 %v461_v47, %v549_v1  ;;  %v275_v55 = vmul.f32 %v462_v48, %v549_v1  ;;  %v469_v56 = vunpack.c.l.bf16 %v484_v44  ;;  %v470_v57 = vunpack.c.h.bf16 %v484_v44 }
  0x1b   : > { %349 = vst [vmem:[%s583_s6 + $0x20] sm:$0xff] %v331_v45  ;;  %350 = vst [vmem:[%s583_s6 + $0x28] sm:$0xff] %v332_v46  ;;  %v276_v60 = vmul.f32 %v465_v52, %v549_v1  ;;  %v277_v61 = vmul.f32 %v466_v53, %v549_v1  ;;  %v473_v62 = vunpack.c.l.bf16 %v485_v49  ;;  %v474_v63 = vunpack.c.h.bf16 %v485_v49 }
  0x1c   : > { %351 = vst [vmem:[%s583_s6 + $0x30] sm:$0xff] %v333_v50  ;;  %352 = vst [vmem:[%s583_s6 + $0x38] sm:$0xff] %v334_v51  ;;  %v299_v0 = vadd.f32 %v562_v5, %v274_v54  ;;  %v300_v2 = vadd.f32 %v562_v5, %v275_v55  ;;  %v278_v6 = vmul.f32 %v469_v56, %v549_v1  ;;  %v477_v27 = vunpack.c.l.bf16 %v486_v14 }
  0x1d   : > { %v279_v7 = vmul.f32 %v470_v57, %v549_v1  ;;  %v301_v8 = vadd.f32 %v562_v5, %v276_v60  ;;  %v302_v9 = vadd.f32 %v562_v5, %v277_v61  ;;  %v280_v12 = vmul.f32 %v473_v62, %v549_v1 }
  0x1e   : > { %v281_v13 = vmul.f32 %v474_v63, %v549_v1  ;;  %v335_v15 = vadd.f32 %v317_v58, %v299_v0  ;;  %v336_v16 = vadd.f32 %v318_v59, %v300_v2  ;;  %v303_v17 = vadd.f32 %v562_v5, %v278_v6 }
  0x1f   : > { %v304_v18 = vadd.f32 %v562_v5, %v279_v7  ;;  %v337_v21 = vadd.f32 %v319_v3, %v301_v8  ;;  %v338_v22 = vadd.f32 %v320_v4, %v302_v9  ;;  %v305_v23 = vadd.f32 %v562_v5, %v280_v12 }
  0x20   : > { %v306_v24 = vadd.f32 %v562_v5, %v281_v13  ;;  %353 = vst [vmem:[%s583_s6 + $0x40] sm:$0xff] %v335_v15  ;;  %354 = vst [vmem:[%s583_s6 + $0x48] sm:$0xff] %v336_v16  ;;  %v339_v25 = vadd.f32 %v321_v10, %v303_v17  ;;  %v478_v28 = vunpack.c.h.bf16 %v486_v14  ;;  %v282_v31 = vmul.f32 %v477_v27, %v549_v1 }
  0x21   : > { %v340_v26 = vadd.f32 %v322_v11, %v304_v18  ;;  %355 = vst [vmem:[%s583_s6 + $0x50] sm:$0xff] %v337_v21  ;;  %356 = vst [vmem:[%s583_s6 + $0x58] sm:$0xff] %v338_v22  ;;  %v341_v29 = vadd.f32 %v323_v19, %v305_v23 }
  0x22   : > { %v342_v30 = vadd.f32 %v324_v20, %v306_v24  ;;  %357 = vst [vmem:[%s583_s6 + $0x60] sm:$0xff] %v339_v25  ;;  %v283_v32 = vmul.f32 %v478_v28, %v549_v1  ;;  %v307_v35 = vadd.f32 %v562_v5, %v282_v31 }
  0x23   : > { %358 = vst [vmem:[%s583_s6 + $0x68] sm:$0xff] %v340_v26  ;;  %359 = vst [vmem:[%s583_s6 + $0x70] sm:$0xff] %v341_v29 }
  0x24   : > { %360 = vst [vmem:[%s583_s6 + $0x78] sm:$0xff] %v342_v30  ;;  %v308_v36 = vadd.f32 %v562_v5, %v283_v32  ;;  %v343_v37 = vadd.f32 %v325_v33, %v307_v35 }
  0x26   : > { %v344_v38 = vadd.f32 %v326_v34, %v308_v36  ;;  %361 = vst [vmem:[%s583_s6 + $0x80] sm:$0xff] %v343_v37 }
  0x28   : > { %362 = vst [vmem:[%s583_s6 + $0x88] sm:$0xff] %v344_v38 }
  0x29 PF: > { %s14_s15 = sadd.s32 1, %s501_s15  }
  0x2a   : > { %p11_p4 = scmp.ge.s32.totalorder %s14_s15, 4  }
  0x2c   :  { %13 = sbr.rel (!%p11_p4) target bundleno = 1 (0x1), region = 69 }

// kernel: preact_basic_block_convq.3
= control target key start
LH: loop header
LB: loop body
LE: loop exit
PB: predicated region body
PF: predicated region fallthrough
CT: control target
= control target key end

     0   :  { %s2933_s21 = smov 0   ;;  %s2935_s22 = smov 0   ;;  %s3964_s0 = inlined_call_operand.vmem [shape: bf16[288,128], index: 0, kind: input, shape index: {}]   ;;  %s3965_s1 = inlined_call_operand.vmem [shape: f32[1,128], index: 1, kind: input, shape index: {}]   ;;  %s3966_s2 = inlined_call_operand.vmem [shape: f32[1,128], index: 2, kind: input, shape index: {}]   ;;  %s3967_s3 = inlined_call_operand.vmem [shape: bf16[3,128,128], index: 3, kind: input, shape index: {}]   ;;  %s3968_s4 = inlined_call_operand.vmem [shape: f32[128,8], index: 4, kind: input, shape index: {}]   ;;  %s3969_s5 = inlined_call_operand.vmem [shape: bf16[288,128], index: 5, kind: output, shape index: {0}]   ;;  %s3970_s6 = inlined_call_operand.vmem [shape: f32[2,2,8], index: 6, kind: output, shape index: {1}]  }
   0x1   :  { %s2937_s23 = smov 0  }
   0x2 LB: > { %s29_s24 = sadd.s32 1, %s2890_s22  ;;  %p2095_p0 = scmp.ge.s32.totalorder %s2894_s23, 1  ;;  %s2894_s23 = sphi %s2937_s23, %s17_s23   ;;  %s2890_s22 = sphi %s2935_s22, %s4085_s22   ;;  %s2886_s21 = sphi %s2933_s21, %s4084_s21  }
   0x3   : > { %p31_p1 = scmp.ge.s32.totalorder %s29_s24, 2  ;;  %p234_p2 = scmp.lt.s32.totalorder %s2894_s23, 3 }
   0x5   : > { %s4087_s24 = smov (%p31_p1, %s29_s24), 0  ;;  %p235_p3 = pnand %p2095_p0, %p234_p2 }
   0x6   : > { %v2848_v0 = vld [vmem:[%s3967_s3] sm:$0xff] (!%p235_p3)   ;;  %v2896_v1 = vmov (!%p235_p3), 0.0   ;;  %v291_v3 = vlaneseq (!%p235_p3)  ;;  %v2850_v4 = vld [vmem:[%s3967_s3 + $0x8] sm:$0xff] (!%p235_p3)   ;;  %vm3973_vm0 = vmmov (!%p235_p3), 0   ;;  %s271_s7 = smul.u32 (!%p235_p3), 18, %s2886_s21  ;;  %v2852_v7 = vld [vmem:[%s3967_s3 + $0x10] sm:$0xff] (!%p235_p3)  }
   0x7   : > { %238 = sbr.rel (%p235_p3) target bundleno = 676 (0x2a4), region = 40  ;;  %2494 = vmatprep.subr.bf16.mxu0 (!%p235_p3), %v2896_v1  ;;  %2546 = vmatprep.subr.bf16.mxu1 (!%p235_p3), %v2896_v1  ;;  %v2849_v2 = vld [vmem:[%s3967_s3 + $0x40] sm:$0xff] (!%p235_p3)   ;;  %v2851_v5 = vld [vmem:[%s3967_s3 + $0x48] sm:$0xff] (!%p235_p3)   ;;  %v2853_v8 = vld [vmem:[%s3967_s3 + $0x50] sm:$0xff] (!%p235_p3)   ;;  %p286_p5 = scmp.lt.s32.totalorder (!%p235_p3), %s2886_s21, 1 }
   0x8   : > { %2495 = vmatpush3.bf16.msra.mxu0 (!%p235_p3), %v2848_v0  ;;  %2510 = vmatprep.mubr.msk.bf16.mxu0 (!%p235_p3), %vm3973_vm0, %v2896_v1  ;;  %p272_p4 = scmp.lt.s32.totalorder (!%p235_p3), %s271_s7, 35  ;;  %v2974_v6 = vshrl.u32 (!%p235_p3), %v291_v3, 7  ;;  %v2854_v9 = vld [vmem:[%s3967_s3 + $0x18] sm:$0xff] (!%p235_p3)   ;;  %v2856_v13 = vld [vmem:[%s3967_s3 + $0x20] sm:$0xff] (!%p235_p3)   ;;  %v2858_v25 = vld [vmem:[%s3967_s3 + $0x28] sm:$0xff] (!%p235_p3)  }
   0x9   : > { %2496 = vmatprep.subr.bf16.mxu0 (!%p235_p3), %v2896_v1  ;;  %2547 = vmatpush3.bf16.msra.mxu1 (!%p235_p3), %v2849_v2  ;;  %v2855_v11 = vld [vmem:[%s3967_s3 + $0x58] sm:$0xff] (!%p235_p3)   ;;  %v2857_v19 = vld [vmem:[%s3967_s3 + $0x60] sm:$0xff] (!%p235_p3)   ;;  %v2859_v30 = vld [vmem:[%s3967_s3 + $0x68] sm:$0xff] (!%p235_p3)  }
   0xa   : > { %2548 = vmatprep.subr.bf16.mxu1 (!%p235_p3), %v2896_v1  ;;  %2562 = vmatprep.mubr.msk.bf16.mxu1 (!%p235_p3), %vm3973_vm0, %v2896_v1  ;;  %v293_v10 = vadd.s32 (!%p235_p3), 8, %v2974_v6  ;;  %v2996_v12 = vadd.s32 (!%p235_p3), 16, %v2974_v6  ;;  %v3010_v14 = vadd.s32 (!%p235_p3), 24, %v2974_v6  ;;  %v3013_v15 = vadd.s32 (!%p235_p3), 32, %v2974_v6  ;;  %v3043_v28 = vld [vmem:[%s3965_s1] ss:$0 sm:$0xff] (!%p235_p3) }
   0xb   : > { %v3016_v16 = vadd.s32 (!%p235_p3), 40, %v2974_v6  ;;  %v3019_v17 = vadd.s32 (!%p235_p3), 48, %v2974_v6  ;;  %v3022_v18 = vadd.s32 (!%p235_p3), 56, %v2974_v6  ;;  %v3048_v29 = vld [vmem:[%s3966_s2] ss:$0 sm:$0xff] (!%p235_p3)  ;;  %v3072_v48 = vadd.s32 (!%p235_p3), 64, %v2974_v6 }
   0xc   : > { %2497 = vmatpush3.bf16.msra.mxu0 (!%p235_p3), %v2850_v4  ;;  %v3029_v20 = vmul.u32.u64.low (!%p235_p3), 3817748708, %v2974_v6  ;;  %v3030_v21 = vmul.u32.u64.high 3817748708, %v2974_v6, %v3029_v20  ;;  %v3032_v22 = vmul.u32.u64.low (!%p235_p3), 3817748708, %v293_v10  ;;  %v3033_v23 = vmul.u32.u64.high 3817748708, %v293_v10, %v3032_v22  ;;  %v2860_v49 = vld [vmem:[%s3967_s3 + $0x30] sm:$0xff] (!%p235_p3)   ;;  %v2862_v63 = vld [vmem:[%s3967_s3 + $0x38] sm:$0xff] (!%p235_p3)  }
   0xd   : > { %2498 = vmatprep.subr.bf16.mxu0 (!%p235_p3), %v2896_v1  ;;  %2549 = vmatpush3.bf16.msra.mxu1 (!%p235_p3), %v2851_v5  ;;  %v3056_v33 = vmul.u32.u64.low (!%p235_p3), 3817748708, %v2996_v12  ;;  %v3057_v34 = vmul.u32.u64.high 3817748708, %v2996_v12, %v3056_v33  ;;  %v3064_v38 = vmul.u32.u64.low (!%p235_p3), 3817748708, %v3010_v14  ;;  %v3065_v39 = vmul.u32.u64.high 3817748708, %v3010_v14, %v3064_v38  ;;  %v2861_v54 = vld [vmem:[%s3967_s3 + $0x70] sm:$0xff] (!%p235_p3)   ;;  %v2863_v3 = vld [vmem:[%s3967_s3 + $0x78] sm:$0xff] (!%p235_p3)  }
   0xe   : > { %s4089_s7 = smov (!%p272_p4, %s271_s7), 35  ;;  %2550 = vmatprep.subr.bf16.mxu1 %v2896_v1  ;;  %v316_v36 = vshrl.u32 %v3030_v21, 4  ;;  %v327_v37 = vshrl.u32 %v3033_v23, 4  ;;  %v4008_v21 = vmov 0  ;;  %v4010_v23 = vmov 0  ;;  %s4091_s21 = smov (!%p286_p5, %s2886_s21), 1 }
   0xf   : > { %s2096_s14 = sshll.u32 %s4089_s7, 2  ;;  %v338_v50 = vshrl.u32 %v3057_v34, 4  ;;  %v349_v57 = vshrl.u32 %v3065_v39, 4  ;;  %v2865_v39 = vld [vmem:[%s3967_s3 + $0x88] sm:$0xff]   ;;  %s2098_s7 = sshll.u32 %s4091_s21, 1 }
  0x10   : > { %2499 = vmatpush3.bf16.msra.mxu0 %v2852_v7  ;;  %s3007_s27 = scalar_lea.vmem %s3964_s0, %s2096_s14  ;;  %v317_v45 = vmul.u32 18, %v316_v36  ;;  %v328_v46 = vmul.u32 18, %v327_v37  ;;  %s3730_s25 = scalar_lea.vmem %s3969_s5, %s2096_s14 }
  0x11   : > { %2500 = vmatprep.subr.bf16.mxu0 %v2896_v1  ;;  %2551 = vmatpush3.bf16.msra.mxu1 %v2853_v8  ;;  %v2295_v24 = vld [vmem:[%s3007_s27] sm:$0xff]   ;;  %v2375_v35 = vld [vmem:[%s3007_s27 + $0x8] sm:$0xff]   ;;  %v2376_v44 = vld [vmem:[%s3007_s27 + $0x10] sm:$0xff]   ;;  %v339_v60 = vmul.u32 18, %v338_v50  ;;  %v350_v5 = vmul.u32 18, %v349_v57 }
  0x12   : > { %2552 = vmatprep.subr.bf16.mxu1 %v2896_v1  ;;  %v2296_v26 = vunpack.c.l.bf16 %v2295_v24  ;;  %v2297_v27 = vunpack.c.h.bf16 %v2295_v24  ;;  %v2300_v42 = vunpack.c.l.bf16 %v2375_v35  ;;  %v2301_v43 = vunpack.c.h.bf16 %v2375_v35  ;;  %v2377_v20 = vld [vmem:[%s3007_s27 + $0x18] sm:$0xff]   ;;  %v2866_v57 = vld [vmem:[%s3967_s3 + $0x90] sm:$0xff]  }
  0x13   : > { %v2304_v47 = vunpack.c.l.bf16 %v2376_v44  ;;  %v2305_v53 = vunpack.c.h.bf16 %v2376_v44  ;;  %v318_v55 = vsub.s32 %v2974_v6, %v317_v45  ;;  %v329_v56 = vsub.s32 %v293_v10, %v328_v46 }
  0x14   : > { %2501 = vmatpush3.bf16.msra.mxu0 %v2854_v9  ;;  %v695_v31 = vmul.f32 %v2296_v26, %v3043_v28  ;;  %v696_v32 = vmul.f32 %v2297_v27, %v3043_v28  ;;  %v697_v51 = vmul.f32 %v2300_v42, %v3043_v28  ;;  %v698_v52 = vmul.f32 %v2301_v43, %v3043_v28  ;;  %v1547_v27 = vld [vmem:[%s3968_s4 + $0x8] sm:$0xff] }
  0x15   : > { %2502 = vmatprep.subr.bf16.mxu0 %v2896_v1  ;;  %2553 = vmatpush3.bf16.msra.mxu1 %v2855_v11  ;;  %v699_v58 = vmul.f32 %v2304_v47, %v3043_v28  ;;  %vm508_vm1 = vcmp.ne.s32.totalorder %v318_v55, 0  ;;  %vm509_vm2 = vcmp.ne.s32.totalorder %v329_v56, 0  ;;  %vm526_vm3 = vcmp.lt.s32.totalorder %v318_v55, 0 }
  0x16   : > { %2554 = vmatprep.subr.bf16.mxu1 %v2896_v1  ;;  %v720_v40 = vadd.f32 %v3048_v29, %v695_v31  ;;  %v721_v41 = vadd.f32 %v3048_v29, %v696_v32  ;;  %v722_v61 = vadd.f32 %v3048_v29, %v697_v51  ;;  %v723_v62 = vadd.f32 %v3048_v29, %v698_v52  ;;  %vm544_vm5 = vmand %vm526_vm3, %vm508_vm1  ;;  %v3178_v51 = vld [vmem:[%s3007_s27 + $0x20] sm:$0xff]   ;;  %v1549_v52 = vld [vmem:[%s3968_s4 + $0x18] sm:$0xff] }
  0x17   : > { %vm527_vm4 = vcmp.lt.s32.totalorder %v329_v56, 0  ;;  %v562_v0 = vadd.s32 18, %v318_v55  ;;  %v563_v2 = vadd.s32 18, %v329_v56  ;;  %v340_v4 = vsub.s32 %v2996_v12, %v339_v60  ;;  %v2864_v12 = vld [vmem:[%s3967_s3 + $0x80] sm:$0xff]  }
  0x18   : > { %2503 = vmatpush3.bf16.msra.mxu0 %v2856_v13  ;;  %v3088_v59 = vpack.c.bf16 %v721_v41, %v720_v40  ;;  %vm545_vm6 = vmand %vm527_vm4, %vm509_vm2  ;;  %v3101_v7 = vmul.u32.u64.low 3817748708, %v3013_v15  ;;  %v3102_v8 = vmul.u32.u64.high 3817748708, %v3013_v15, %v3101_v7  ;;  %v700_v9 = vmul.f32 %v2305_v53, %v3043_v28 }
  0x19   : > { %2504 = vmatprep.subr.bf16.mxu0 %v2896_v1  ;;  %2555 = vmatpush3.bf16.msra.mxu1 %v2857_v19  ;;  %v724_v10 = vadd.f32 %v3048_v29, %v699_v58  ;;  %v580_v11 = vsel %vm544_vm5, %v562_v0, %v318_v55  ;;  %v581_v13 = vsel %vm545_vm6, %v563_v2, %v329_v56  ;;  %vm510_vm7 = vcmp.ne.s32.totalorder %v340_v4, 0  ;;  %v2867_v7 = vld [vmem:[%s3967_s3 + $0x98] sm:$0xff]  }
  0x1a   : > { %2556 = vmatprep.subr.bf16.mxu1 %v2896_v1  ;;  %v351_v19 = vsub.s32 %v3010_v14, %v350_v5  ;;  %vm598_vm8 = vcmp.ne.s32.totalorder %v580_v11, 0  ;;  %vm599_vm9 = vcmp.ne.s32.totalorder %v581_v13, 0  ;;  %vm616_vm10 = vcmp.ne.s32.totalorder %v580_v11, 17 }
  0x1b   : > { %vm617_vm11 = vcmp.ne.s32.totalorder %v581_v13, 17  ;;  %vm3112_vm12 = vmand %vm598_vm8, %vm616_vm10  ;;  %vm528_vm14 = vcmp.lt.s32.totalorder %v340_v4, 0  ;;  %v564_v22 = vadd.s32 18, %v340_v4  ;;  %v360_v24 = vshrl.u32 %v3102_v8, 4 }
  0x1c   : > { %2505 = vmatpush3.bf16.msra.mxu0 %v2858_v25  ;;  %v4009_v21 = vsel %vm3112_vm12, 4294967295, %v4008_v21  ;;  %vm511_vm13 = vcmp.ne.s32.totalorder %v351_v19, 0  ;;  %vm529_vm15 = vcmp.lt.s32.totalorder %v351_v19, 0  ;;  %vm3116_vm1 = vmand %vm599_vm9, %vm617_vm11  ;;  %v565_v14 = vadd.s32 18, %v351_v19 }
  0x1d   : > { %2506 = vmatprep.subr.bf16.mxu0 %v2896_v1  ;;  %2557 = vmatpush3.bf16.msra.mxu1 %v2859_v30  ;;  %v4011_v23 = vsel %vm3116_vm1, 4294967295, %v4010_v23  ;;  %v3123_v25 = vmul.u32.u64.low 3817748708, %v3016_v16  ;;  %v3124_v26 = vmul.u32.u64.high 3817748708, %v3016_v16, %v3123_v25  ;;  %vm3130_vm2 = vmpackc.low %vm3116_vm1, %vm3112_vm12  ;;  %v725_v30 = vadd.f32 %v3048_v29, %v700_v9 }
  0x1e   : > { %2558 = vmatprep.subr.bf16.mxu1 %v2896_v1  ;;  %v3136_v31 = vmul.u32.u64.low 3817748708, %v3019_v17  ;;  %v3137_v32 = vmul.u32.u64.high 3817748708, %v3019_v17, %v3136_v31  ;;  %v2308_v33 = vunpack.c.l.bf16 %v2377_v20  ;;  %vm546_vm3 = vmand %vm528_vm14, %vm510_vm7  ;;  %v3143_v34 = vpack.c.bf16 %v723_v62, %v722_v61 }
  0x1f   : > { %v361_v35 = vmul.u32 18, %v360_v24  ;;  %v3146_v36 = vmul.u32.u64.low 3817748708, %v3022_v18  ;;  %v3147_v37 = vmul.u32.u64.high 3817748708, %v3022_v18, %v3146_v36  ;;  %vm547_vm4 = vmand %vm529_vm15, %vm511_vm13  ;;  %v582_v38 = vsel %vm546_vm3, %v564_v22, %v340_v4 }
  0x20   : > { %2507 = vmatpush3.bf16.msra.mxu0 %v2860_v49  ;;  %v3157_v40 = vpack.c.bf16 %v725_v30, %v724_v10  ;;  %v2309_v41 = vunpack.c.h.bf16 %v2377_v20  ;;  %v701_v42 = vmul.f32 %v2308_v33, %v3043_v28  ;;  %v583_v43 = vsel %vm547_vm4, %v565_v14, %v351_v19  ;;  %v2379_v14 = vld [vmem:[%s3007_s27 + $0x28] sm:$0xff]   ;;  %v2868_v30 = vld [vmem:[%s3967_s3 + $0xa0] sm:$0xff]  }
  0x21   : > { %2508 = vmatprep.subr.bf16.mxu0 %v2896_v1  ;;  %2559 = vmatpush3.bf16.msra.mxu1 %v2861_v54  ;;  %vm600_vm5 = vcmp.ne.s32.totalorder %v582_v38, 0  ;;  %vm618_vm6 = vcmp.ne.s32.totalorder %v582_v38, 17  ;;  %v362_v44 = vsub.s32 %v3013_v15, %v361_v35  ;;  %vm601_vm7 = vcmp.ne.s32.totalorder %v583_v43, 0 }
  0x22   : > { %2560 = vmatprep.subr.bf16.mxu1 %v2896_v1  ;;  %vm619_vm8 = vcmp.ne.s32.totalorder %v583_v43, 17  ;;  %vm3164_vm9 = vmand %vm600_vm5, %vm618_vm6  ;;  %v4014_v45 = vmov 0  ;;  %v371_v46 = vshrl.u32 %v3124_v26, 4  ;;  %v382_v47 = vshrl.u32 %v3137_v32, 4 }
  0x23   : > { %v4015_v45 = vsel %vm3164_vm9, 4294967295, %v4014_v45  ;;  %vm3172_vm10 = vmand %vm601_vm7, %vm619_vm8  ;;  %v4016_v49 = vmov 0  ;;  %vm512_vm11 = vcmp.ne.s32.totalorder %v362_v44, 0  ;;  %vm530_vm13 = vcmp.lt.s32.totalorder %v362_v44, 0 }
  0x24   : > { %2509 = vmatpush3.bf16.msra.mxu0 %v2862_v63  ;;  %v4017_v49 = vsel %vm3172_vm10, 4294967295, %v4016_v49  ;;  %v566_v15 = vadd.s32 18, %v362_v44  ;;  %v393_v50 = vshrl.u32 %v3147_v37, 4  ;;  %vm3184_vm14 = vmpackc.low %vm3172_vm10, %vm3164_vm9  ;;  %v372_v53 = vmul.u32 18, %v371_v46 }
  0x25   : > { %2561 = vmatpush3.bf16.msra.mxu1 %v2863_v3  ;;  %2598 = vmatprep.subr.bf16.mxu0 %v2896_v1  ;;  %v383_v54 = vmul.u32 18, %v382_v47  ;;  %v702_v55 = vmul.f32 %v2309_v41, %v3043_v28  ;;  %v3190_v56 = vadd.s32 72, %v2974_v6  ;;  %vm548_vm15 = vmand %vm530_vm13, %vm512_vm11  ;;  %v3197_v60 = vadd.f32 %v3048_v29, %v701_v42 }
  0x26   : > { %v394_v58 = vmul.u32 18, %v393_v50  ;;  %v3200_v61 = vmul.u32.u64.low 3817748708, %v3072_v48  ;;  %v3201_v62 = vmul.u32.u64.high 3817748708, %v3072_v48, %v3200_v61  ;;  %v373_v63 = vsub.s32 %v3016_v16, %v372_v53 }
  0x27   : > { %2511 = vmatmul.mubr.msk.bf16.vlgmr.msra.gmra.mrb[0].mxu0 %vm3130_vm2, %v3088_v59  ;;  %v584_v0 = vsel %vm548_vm15, %v566_v15, %v362_v44  ;;  %v384_v2 = vsub.s32 %v3019_v17, %v383_v54  ;;  %v2312_v3 = vunpack.c.l.bf16 %v3178_v51  ;;  %v3211_v5 = vadd.f32 %v3048_v29, %v702_v55  ;;  %v2869_v15 = vld [vmem:[%s3967_s3 + $0xa8] sm:$0xff]   ;;  %v2380_v54 = vld [vmem:[%s3007_s27 + $0x30] sm:$0xff]  }
  0x28   : > { %2599 = vmatpush3.bf16.msra.mxu0 %v2864_v12  ;;  %2563 = vmatmul.mubr.msk.bf16.vlgmr.msra.gmra.mrb[0].mxu1 %vm3130_vm2, %v3088_v59  ;;  %vm602_vm3 = vcmp.ne.s32.totalorder %v584_v0, 0  ;;  %vm620_vm4 = vcmp.ne.s32.totalorder %v584_v0, 17  ;;  %v395_v4 = vsub.s32 %v3022_v18, %v394_v58  ;;  %vm513_vm5 = vcmp.ne.s32.totalorder %v373_v63, 0 }
  0x29   : > { %2514 = vmatprep.mubr.msk.bf16.mxu0 %vm3973_vm0, %v2896_v1  ;;  %2600 = vmatprep.subr.bf16.mxu0 %v2896_v1  ;;  %vm531_vm6 = vcmp.lt.s32.totalorder %v373_v63, 0  ;;  %v567_v16 = vadd.s32 18, %v373_v63  ;;  %vm3218_vm7 = vmand %vm602_vm3, %vm620_vm4  ;;  %v4020_v17 = vmov 0  ;;  %vm514_vm8 = vcmp.ne.s32.totalorder %v384_v2, 0 }
  0x2a   : > { %2566 = vmatprep.mubr.msk.bf16.mxu1 %vm3973_vm0, %v2896_v1  ;;  %v4021_v17 = vsel %vm3218_vm7, 4294967295, %v4020_v17  ;;  %vm549_vm11 = vmand %vm531_vm6, %vm513_vm5  ;;  %vm515_vm13 = vcmp.ne.s32.totalorder %v395_v4, 0  ;;  %vm532_vm15 = vcmp.lt.s32.totalorder %v384_v2, 0  ;;  %vm533_vm10 = vcmp.lt.s32.totalorder %v395_v4, 0 }
  0x2b   : > { %v568_v18 = vadd.s32 18, %v384_v2  ;;  %v585_v8 = vsel %vm549_vm11, %v567_v16, %v373_v63  ;;  %vm550_vm3 = vmand %vm532_vm15, %vm514_vm8  ;;  %v569_v9 = vadd.s32 18, %v395_v4  ;;  %v404_v10 = vshrl.u32 %v3201_v62, 4  ;;  %v2870_v16 = vld [vmem:[%s3967_s3 + $0xb0] sm:$0xff]  }
  0x2c   : > { %2601 = vmatpush3.bf16.msra.mxu0 %v2865_v39  ;;  %v2313_v11 = vunpack.c.h.bf16 %v3178_v51  ;;  %vm603_vm4 = vcmp.ne.s32.totalorder %v585_v8, 0  ;;  %vm621_vm5 = vcmp.ne.s32.totalorder %v585_v8, 17  ;;  %vm551_vm6 = vmand %vm533_vm10, %vm515_vm13  ;;  %v703_v12 = vmul.f32 %v2312_v3, %v3043_v28 }
  0x2d   : > { %2602 = vmatprep.subr.bf16.mxu0 %v2896_v1  ;;  %v586_v13 = vsel %vm550_vm3, %v568_v18, %v384_v2  ;;  %v4022_v19 = vmov 0  ;;  %v587_v20 = vsel %vm551_vm6, %v569_v9, %v395_v4  ;;  %v405_v22 = vmul.u32 18, %v404_v10 }
  0x2e   : > { %vm604_vm11 = vcmp.ne.s32.totalorder %v586_v13, 0  ;;  %vm622_vm8 = vcmp.ne.s32.totalorder %v586_v13, 17  ;;  %v4024_v24 = vmov 0  ;;  %vm605_vm10 = vcmp.ne.s32.totalorder %v587_v20, 0 }
  0x2f   : > { %2515 = vmatmul.mubr.msk.bf16.gmra.mrb[4].mxu0 %vm3184_vm14, %v3143_v34  ;;  %vm623_vm13 = vcmp.ne.s32.totalorder %v587_v20, 17  ;;  %v3245_v25 = vmul.u32.u64.low 3817748708, %v3190_v56  ;;  %v3246_v26 = vmul.u32.u64.high 3817748708, %v3190_v56, %v3245_v25  ;;  %v406_v31 = vsub.s32 %v3072_v48, %v405_v22  ;;  %vm3261_vm3 = vmand %vm604_vm11, %vm622_vm8 }
  0x30   : > { %2567 = vmatmul.mubr.msk.bf16.gmra.mrb[4].mxu1 %vm3184_vm14, %v3143_v34  ;;  %2518 = vmatprep.mubr.msk.bf16.mxu0 %vm3973_vm0, %v2896_v1  ;;  %v704_v32 = vmul.f32 %v2313_v11, %v3043_v28  ;;  %v728_v33 = vadd.f32 %v3048_v29, %v703_v12  ;;  %v302_v35 = vadd.s32 80, %v2974_v6  ;;  %v4026_v36 = vmov 0 }
  0x31   : > { %2570 = vmatprep.mubr.msk.bf16.mxu1 %vm3973_vm0, %v2896_v1  ;;  %2603 = vmatpush3.bf16.msra.mxu0 %v2866_v57  ;;  %vm3231_vm0 = vmand %vm603_vm4, %vm621_vm5  ;;  %v4027_v36 = vsel %vm3261_vm3, 4294967295, %v4026_v36  ;;  %v3266_v48 = vadd.s32 88, %v2974_v6  ;;  %v2316_v37 = vunpack.c.l.bf16 %v2379_v14  ;;  %v2317_v38 = vunpack.c.h.bf16 %v2379_v14 }
  0x32   : > { %2604 = vmatprep.subr.bf16.mxu0 %v2896_v1  ;;  %v4023_v19 = vsel %vm3231_vm0, 4294967295, %v4022_v19  ;;  %vm3240_vm15 = vmpackc.low %vm3231_vm0, %vm3218_vm7  ;;  %v3269_v39 = vadd.s32 96, %v2974_v6  ;;  %vm4028_vm4 = vmmov 0   ;;  %v4029_v41 = vmov 0 }
  0x33   : > { %v4025_v24 = vsel %vm3240_vm15, 4294967295, %v4024_v24  ;;  %vm3278_vm5 = vmand %vm605_vm10, %vm623_vm13  ;;  %vm516_vm6 = vcmp.ne.s32.totalorder %v406_v31, 0  ;;  %vm534_vm11 = vcmp.lt.s32.totalorder %v406_v31, 0  ;;  %v570_v42 = vadd.s32 18, %v406_v31 }
  0x34   : > { %v4030_v41 = vsel %vm3278_vm5, 4294967295, %v4029_v41  ;;  %v729_v43 = vadd.f32 %v3048_v29, %v704_v32  ;;  %v415_v44 = vshrl.u32 %v3246_v26, 4  ;;  %vm552_vm8 = vmand %vm534_vm11, %vm516_vm6  ;;  %v3300_v55 = vpack.c.bf16 %v3211_v5, %v3197_v60 }
  0x35   : > { %2605 = vmatpush3.bf16.msra.mxu0 %v2867_v7  ;;  %v3286_v46 = vmul.u32.u64.low 3817748708, %v302_v35  ;;  %v3287_v47 = vmul.u32.u64.high 3817748708, %v302_v35, %v3286_v46  ;;  %v588_v50 = vsel %vm552_vm8, %v570_v42, %v406_v31  ;;  %v705_v61 = vmul.f32 %v2316_v37, %v3043_v28  ;;  %vm3309_vm10 = vmpackc.low %vm3278_vm5, %vm3261_vm3 }
  0x36   : > { %2606 = vmatprep.subr.bf16.mxu0 %v2896_v1  ;;  %v3293_v51 = vmul.u32.u64.low 3817748708, %v3266_v48  ;;  %v3294_v53 = vmul.u32.u64.high 3817748708, %v3266_v48, %v3293_v51  ;;  %v416_v57 = vmul.u32 18, %v415_v44  ;;  %v3302_v58 = vpack.c.bf16 %v729_v43, %v728_v33 }
  0x37   : > { %2519 = vmatmul.mubr.msk.bf16.gmra.mrb[8].mxu0 %vm3240_vm15, %v3157_v40  ;;  %v4031_v62 = vmov 0  ;;  %v706_v63 = vmul.f32 %v2317_v38, %v3043_v28  ;;  %v3315_v0 = vadd.s32 104, %v2974_v6  ;;  %v426_v4 = vshrl.u32 %v3287_v47, 4 }
  0x38   : > { %2571 = vmatmul.mubr.msk.bf16.gmra.mrb[8].mxu1 %vm3240_vm15, %v3157_v40  ;;  %2522 = vmatprep.mubr.msk.bf16.mxu0 %vm4028_vm4, %v2896_v1  ;;  %v4032_v62 = vsel %vm3309_vm10, 4294967295, %v4031_v62  ;;  %v3318_v60 = vmul.u32.u64.low 3817748708, %v3269_v39  ;;  %v3319_v2 = vmul.u32.u64.high 3817748708, %v3269_v39, %v3318_v60  ;;  %v417_v3 = vsub.s32 %v3190_v56, %v416_v57  ;;  %v2381_v57 = vld [vmem:[%s3007_s27 + $0x38] sm:$0xff]  }
  0x39   : > { %2574 = vmatprep.mubr.msk.bf16.mxu1 %vm4028_vm4, %v2896_v1  ;;  %2607 = vmatpush3.bf16.msra.mxu0 %v2868_v30  ;;  %v2320_v5 = vunpack.c.l.bf16 %v2380_v54  ;;  %vm624_vm6 = vcmp.ne.s32.totalorder %v588_v50, 17  ;;  %v437_v18 = vshrl.u32 %v3294_v53, 4  ;;  %v427_v9 = vmul.u32 18, %v426_v4  ;;  %v2871_v30 = vld [vmem:[%s3967_s3 + $0xb8] sm:$0xff]   ;;  %v2382_v60 = vld [vmem:[%s3007_s27 + $0x40] sm:$0xff]   ;;  %s3911_s27 = scalar_lea.vmem %s3970_s6, %s2098_s7 }
  0x3a   : > { %2608 = vmatprep.subr.bf16.mxu0 %v2896_v1  ;;  %v3328_v7 = vmul.u32.u64.low 3817748708, %v3315_v0  ;;  %v3329_v8 = vmul.u32.u64.high 3817748708, %v3315_v0, %v3328_v7  ;;  %vm517_vm11 = vcmp.ne.s32.totalorder %v417_v3, 0  ;;  %vm535_vm8 = vcmp.lt.s32.totalorder %v417_v3, 0 }
  0x3b   : > { %v571_v56 = vadd.s32 18, %v417_v3  ;;  %vm553_vm13 = vmand %vm535_vm8, %vm517_vm11  ;;  %v438_v10 = vmul.u32 18, %v437_v18  ;;  %v730_v11 = vadd.f32 %v3048_v29, %v705_v61  ;;  %v731_v13 = vadd.f32 %v3048_v29, %v706_v63 }
  0x3c   : > { %v448_v12 = vshrl.u32 %v3319_v2, 4  ;;  %vm4033_vm5 = vcmp.ne.s32.totalorder %v588_v50, 0  ;;  %v4034_v22 = vmov 0  ;;  %v428_v14 = vsub.s32 %v302_v35, %v427_v9 }
  0x3d   : > { %2609 = vmatpush3.bf16.msra.mxu0 %v2869_v15  ;;  %v589_v20 = vsel %vm553_vm13, %v571_v56, %v417_v3  ;;  %vm3345_vm3 = vmand %vm4033_vm5, %vm624_vm6  ;;  %v2321_v25 = vunpack.c.h.bf16 %v2380_v54  ;;  %v707_v26 = vmul.f32 %v2320_v5, %v3043_v28  ;;  %v439_v31 = vsub.s32 %v3266_v48, %v438_v10 }
  0x3e   : > { %2610 = vmatprep.subr.bf16.mxu0 %v2896_v1  ;;  %v4035_v22 = vsel %vm3345_vm3, 4294967295, %v4034_v22  ;;  %vm607_vm11 = vcmp.ne.s32.totalorder %v589_v20, 0  ;;  %vm625_vm13 = vcmp.ne.s32.totalorder %v589_v20, 17  ;;  %v449_v32 = vmul.u32 18, %v448_v12 }
  0x3f   : > { %2523 = vmatmul.mubr.msk.bf16.gmra.mrb[12].mxu0 %vm3309_vm10, %v3300_v55  ;;  %vm3357_vm5 = vmand %vm607_vm11, %vm625_vm13  ;;  %v4036_v33 = vmov 0  ;;  %vm518_vm6 = vcmp.ne.s32.totalorder %v428_v14, 0  ;;  %vm536_vm8 = vcmp.lt.s32.totalorder %v428_v14, 0  ;;  %v572_v35 = vadd.s32 18, %v428_v14 }
  0x40   : > { %2575 = vmatmul.mubr.msk.bf16.gmra.mrb[12].mxu1 %vm3309_vm10, %v3300_v55  ;;  %2526 = vmatprep.mubr.msk.bf16.mxu0 %vm4028_vm4, %v2896_v1  ;;  %v4037_v33 = vsel %vm3357_vm5, 4294967295, %v4036_v33  ;;  %v459_v37 = vshrl.u32 %v3329_v8, 4  ;;  %vm3366_vm0 = vmpackc.low %vm3357_vm5, %vm3345_vm3  ;;  %v4038_v38 = vmov 0  ;;  %vm519_vm7 = vcmp.ne.s32.totalorder %v439_v31, 0 }
  0x41   : > { %2578 = vmatprep.mubr.msk.bf16.mxu1 %vm4028_vm4, %v2896_v1  ;;  %2611 = vmatpush3.bf16.msra.mxu0 %v2870_v16  ;;  %v4039_v38 = vsel %vm3366_vm0, 4294967295, %v4038_v38  ;;  %vm537_vm9 = vcmp.lt.s32.totalorder %v439_v31, 0  ;;  %v573_v48 = vadd.s32 18, %v439_v31  ;;  %v450_v42 = vsub.s32 %v3269_v39, %v449_v32  ;;  %vm554_vm11 = vmand %vm536_vm8, %vm518_vm6 }
  0x42   : > { %2612 = vmatprep.subr.bf16.mxu0 %v2896_v1  ;;  %v460_v43 = vmul.u32 18, %v459_v37  ;;  %v708_v44 = vmul.f32 %v2321_v25, %v3043_v28  ;;  %v3373_v46 = vadd.s32 112, %v2974_v6  ;;  %v3376_v47 = vadd.s32 120, %v2974_v6  ;;  %vm555_vm13 = vmand %vm537_vm9, %vm519_vm7 }
  0x43   : > { %v590_v15 = vsel %vm554_vm11, %v572_v35, %v428_v14  ;;  %vm520_vm5 = vcmp.ne.s32.totalorder %v450_v42, 0  ;;  %vm538_vm3 = vcmp.lt.s32.totalorder %v450_v42, 0  ;;  %v574_v50 = vadd.s32 18, %v450_v42 }
  0x44   : > { %v591_v39 = vsel %vm555_vm13, %v573_v48, %v439_v31  ;;  %vm608_vm6 = vcmp.ne.s32.totalorder %v590_v15, 0  ;;  %vm626_vm8 = vcmp.ne.s32.totalorder %v590_v15, 17  ;;  %v461_v51 = vsub.s32 %v3315_v0, %v460_v43  ;;  %vm556_vm1 = vmand %vm538_vm3, %vm520_vm5 }
  0x45   : > { %2613 = vmatpush3.bf16.msra.mxu0 %v2871_v30  ;;  %vm609_vm9 = vcmp.ne.s32.totalorder %v591_v39, 0  ;;  %vm627_vm7 = vcmp.ne.s32.totalorder %v591_v39, 17  ;;  %vm3387_vm11 = vmand %vm608_vm6, %vm626_vm8  ;;  %v4040_v53 = vmov 0  ;;  %v3391_v54 = vpack.c.bf16 %v731_v13, %v730_v11 }
  0x46   : > { %v4041_v53 = vsel %vm3387_vm11, 4294967295, %v4040_v53  ;;  %vm3394_vm13 = vmand %vm609_vm9, %vm627_vm7  ;;  %v4042_v61 = vmov 0  ;;  %vm521_vm3 = vcmp.ne.s32.totalorder %v461_v51, 0  ;;  %vm539_vm5 = vcmp.lt.s32.totalorder %v461_v51, 0 }
  0x47   : > { %2527 = vmatmul.mubr.msk.bf16.gmra.mrb[16].mxu0 %vm3366_vm0, %v3302_v58  ;;  %v4043_v61 = vsel %vm3394_vm13, 4294967295, %v4042_v61  ;;  %v575_v63 = vadd.s32 18, %v461_v51  ;;  %v592_v0 = vsel %vm556_vm1, %v574_v50, %v450_v42  ;;  %v732_v2 = vadd.f32 %v3048_v29, %v707_v26  ;;  %vm557_vm6 = vmand %vm539_vm5, %vm521_vm3 }
  0x48   : > { %2579 = vmatmul.mubr.msk.bf16.gmra.mrb[16].mxu1 %vm3366_vm0, %v3302_v58  ;;  %2530 = vmatprep.mubr.msk.bf16.mxu0 %vm4028_vm4, %v2896_v1  ;;  %v733_v3 = vadd.f32 %v3048_v29, %v708_v44  ;;  %v3404_v4 = vmul.u32.u64.low 3817748708, %v3373_v46  ;;  %v3405_v5 = vmul.u32.u64.high 3817748708, %v3373_v46, %v3404_v4  ;;  %v2324_v7 = vunpack.c.l.bf16 %v2381_v57  ;;  %vm3416_vm1 = vmpackc.low %vm3394_vm13, %vm3387_vm11 }
  0x49   : > { %2582 = vmatprep.mubr.msk.bf16.mxu1 %vm4028_vm4, %v2896_v1  ;;  %v3408_v16 = vmul.u32.u64.low 3817748708, %v3376_v47  ;;  %v3409_v18 = vmul.u32.u64.high 3817748708, %v3376_v47, %v3408_v16  ;;  %v308_v8 = vadd.s32 128, %v2974_v6  ;;  %v4044_v56 = vmov 0 }
  0x4a   : > { %v4045_v56 = vsel %vm3416_vm1, 4294967295, %v4044_v56  ;;  %v593_v9 = vsel %vm557_vm6, %v575_v63, %v461_v51  ;;  %vm610_vm8 = vcmp.ne.s32.totalorder %v592_v0, 0  ;;  %v309_v10 = vadd.s32 136, %v2974_v6 }
  0x4b   : > { %v2328_v11 = vunpack.c.l.bf16 %v2382_v60  ;;  %vm611_vm9 = vcmp.ne.s32.totalorder %v593_v9, 0  ;;  %vm628_vm7 = vcmp.ne.s32.totalorder %v592_v0, 17  ;;  %v2325_v13 = vunpack.c.h.bf16 %v2381_v57 }
  0x4c   : > { %v2329_v12 = vunpack.c.h.bf16 %v2382_v60  ;;  %vm629_vm3 = vcmp.ne.s32.totalorder %v593_v9, 17  ;;  %v470_v20 = vshrl.u32 %v3405_v5, 4  ;;  %v481_v26 = vshrl.u32 %v3409_v18, 4  ;;  %vm3439_vm5 = vmand %vm610_vm8, %vm628_vm7 }
  0x4d   : > { %v3422_v14 = vmul.u32.u64.low 3817748708, %v308_v8  ;;  %v3423_v25 = vmul.u32.u64.high 3817748708, %v308_v8, %v3422_v14  ;;  %v709_v30 = vmul.f32 %v2324_v7, %v3043_v28  ;;  %v4046_v35 = vmov 0  ;;  %vm3446_vm6 = vmand %vm611_vm9, %vm629_vm3 }
  0x4e   : > { %v3430_v31 = vmul.u32.u64.low 3817748708, %v309_v10  ;;  %v3431_v32 = vmul.u32.u64.high 3817748708, %v309_v10, %v3430_v31  ;;  %v4047_v35 = vsel %vm3439_vm5, 4294967295, %v4046_v35  ;;  %v471_v37 = vmul.u32 18, %v470_v20  ;;  %vm3466_vm8 = vmpackc.low %vm3446_vm6, %vm3439_vm5 }
  0x4f   : > { %2531 = vmatmul.mubr.msk.bf16.gmra.mrb[20].mxu0 %vm3416_vm1, %v3391_v54  ;;  %v711_v48 = vmul.f32 %v2328_v11, %v3043_v28  ;;  %v712_v42 = vmul.f32 %v2329_v12, %v3043_v28  ;;  %v4048_v43 = vmov 0  ;;  %v482_v44 = vmul.u32 18, %v481_v26 }
  0x50   : > { %2583 = vmatmul.mubr.msk.bf16.gmra.mrb[20].mxu1 %vm3416_vm1, %v3391_v54  ;;  %2534 = vmatprep.mubr.msk.bf16.mxu0 %vm4028_vm4, %v2896_v1  ;;  %v4049_v43 = vsel %vm3446_vm6, 4294967295, %v4048_v43  ;;  %v710_v15 = vmul.f32 %v2325_v13, %v3043_v28  ;;  %v472_v50 = vsub.s32 %v3373_v46, %v471_v37  ;;  %v492_v39 = vshrl.u32 %v3423_v25, 4  ;;  %v1555_v37 = vld [vmem:[%s3968_s4 + $0x48] sm:$0xff] }
  0x51   : > { %2586 = vmatprep.mubr.msk.bf16.mxu1 %vm4028_vm4, %v2896_v1  ;;  %v736_v51 = vadd.f32 %v3048_v29, %v711_v48  ;;  %v737_v57 = vadd.f32 %v3048_v29, %v712_v42  ;;  %v3457_v63 = vpack.c.bf16 %v733_v3, %v732_v2  ;;  %v483_v0 = vsub.s32 %v3376_v47, %v482_v44  ;;  %v1556_v42 = vld [vmem:[%s3968_s4 + $0x50] sm:$0xff]  ;;  %v1557_v44 = vld [vmem:[%s3968_s4 + $0x58] sm:$0xff] }
  0x52   : > { %v734_v60 = vadd.f32 %v3048_v29, %v709_v30  ;;  %v503_v4 = vshrl.u32 %v3431_v32, 4  ;;  %v4050_v28 = vmov 0  ;;  %vm522_vm9 = vcmp.ne.s32.totalorder %v472_v50, 0  ;;  %v1554_v32 = vld [vmem:[%s3968_s4 + $0x40] sm:$0xff] }
  0x53   : > { %v4051_v28 = vsel %vm3466_vm8, 4294967295, %v4050_v28  ;;  %vm540_vm7 = vcmp.lt.s32.totalorder %v472_v50, 0  ;;  %v576_v46 = vadd.s32 18, %v472_v50  ;;  %v493_v5 = vmul.u32 18, %v492_v39  ;;  %v1559_v39 = vld [vmem:[%s3968_s4 + $0x68] sm:$0xff] }
  0x54   : > { %vm523_vm3 = vcmp.ne.s32.totalorder %v483_v0, 0  ;;  %vm541_vm13 = vcmp.lt.s32.totalorder %v483_v0, 0  ;;  %vm558_vm11 = vmand %vm540_vm7, %vm522_vm9  ;;  %v577_v47 = vadd.s32 18, %v483_v0  ;;  %v504_v2 = vmul.u32 18, %v503_v4 }
  0x55   : > { %vm559_vm12 = vmand %vm541_vm13, %vm523_vm3  ;;  %v594_v3 = vsel %vm558_vm11, %v576_v46, %v472_v50  ;;  %v735_v16 = vadd.f32 %v3048_v29, %v710_v15  ;;  %v494_v18 = vsub.s32 %v308_v8, %v493_v5  ;;  %v2134_v7 = vpack.c.bf16 %v737_v57, %v736_v51  ;;  %v1558_v50 = vld [vmem:[%s3968_s4 + $0x60] sm:$0xff]  ;;  %v1560_v57 = vld [vmem:[%s3968_s4 + $0x70] sm:$0xff] }
  0x56   : > { %v595_v9 = vsel %vm559_vm12, %v577_v47, %v483_v0  ;;  %vm612_vm6 = vcmp.ne.s32.totalorder %v594_v3, 0  ;;  %vm630_vm5 = vcmp.ne.s32.totalorder %v594_v3, 17  ;;  %v505_v11 = vsub.s32 %v309_v10, %v504_v2 }
  0x57   : > { %2535 = vmatmul.mubr.msk.bf16.gmra.mrb[24].mxu0 %vm3466_vm8, %v3457_v63  ;;  %vm613_vm11 = vcmp.ne.s32.totalorder %v595_v9, 0  ;;  %vm631_vm13 = vcmp.ne.s32.totalorder %v595_v9, 17  ;;  %vm3479_vm9 = vmand %vm612_vm6, %vm630_vm5  ;;  %vm524_vm7 = vcmp.ne.s32.totalorder %v494_v18, 0  ;;  %vm542_vm3 = vcmp.lt.s32.totalorder %v494_v18, 0 }
  0x58   : > { %2587 = vmatmul.mubr.msk.bf16.gmra.mrb[24].mxu1 %vm3466_vm8, %v3457_v63  ;;  %2538 = vmatprep.mubr.msk.bf16.mxu0 %vm4028_vm4, %v2896_v1  ;;  %vm3483_vm1 = vmand %vm613_vm11, %vm631_vm13  ;;  %v4054_v8 = vmov 0  ;;  %vm525_vm12 = vcmp.ne.s32.totalorder %v505_v11, 0  ;;  %vm543_vm8 = vcmp.lt.s32.totalorder %v505_v11, 0  ;;  %v578_v10 = vadd.s32 18, %v494_v18 }
  0x59   : > { %v4055_v8 = vsel %vm3483_vm1, 4294967295, %v4054_v8  ;;  %2590 = vmatprep.mubr.msk.bf16.mxu1 %vm4028_vm4, %v2896_v1  ;;  %v579_v13 = vadd.s32 18, %v505_v11  ;;  %vm3493_vm5 = vmpackc.low %vm3483_vm1, %vm3479_vm9  ;;  %v2131_v20 = vpack.c.bf16 %v735_v16, %v734_v60  ;;  %v2752_v48 = vpack.c.bf16 %v1555_v37, %v1554_v32 }
  0x5a   : > { %vm560_vm6 = vmand %vm542_vm3, %vm524_vm7  ;;  %v2756_v15 = vpack.c.bf16 %v1557_v44, %v1556_v42  ;;  %v2760_v51 = vpack.c.bf16 %v1559_v39, %v1558_v50  ;;  %vm1383_vm3 = vcmp.lt.s32.totalorder %v2974_v6, 7 }
  0x5b   : > { %vm561_vm11 = vmand %vm543_vm8, %vm525_vm12  ;;  %v596_v14 = vsel %vm560_vm6, %v578_v10, %v494_v18  ;;  %vm4069_vm12 = vnez %v4009_v21  ;;  %vm4071_vm6 = vnez %v4015_v45 }
  0x5c   : > { %v597_v25 = vsel %vm561_vm11, %v579_v13, %v505_v11  ;;  %vm614_vm13 = vcmp.ne.s32.totalorder %v596_v14, 0  ;;  %vm632_vm0 = vcmp.ne.s32.totalorder %v596_v14, 17  ;;  %vm4072_vm11 = vnez %v4017_v49 }
  0x5d   : > { %vm615_vm10 = vcmp.ne.s32.totalorder %v597_v25, 0  ;;  %vm633_vm15 = vcmp.ne.s32.totalorder %v597_v25, 17  ;;  %vm3503_vm1 = vmand %vm614_vm13, %vm632_vm0  ;;  %vm4064_vm0 = vnez %v4025_v24  ;;  %vm4073_vm13 = vnez %v4021_v17 }
  0x5e   : > { %vm3507_vm8 = vmand %vm615_vm10, %vm633_vm15  ;;  %vm4067_vm15 = vnez %v4045_v56  ;;  %vm4068_vm10 = vnez %v4051_v28 }
  0x5f   : > { %2539 = vmatmul.mubr.msk.bf16.gmra.mrb[28].mxu0 %vm3493_vm5, %v2131_v20  ;;  %vm3517_vm7 = vmpackc.low %vm3507_vm8, %vm3503_vm1 }
  0x60   : > { %2591 = vmatmul.mubr.msk.bf16.gmra.mrb[28].mxu1 %vm3493_vm5, %v2131_v20  ;;  %2542 = vmatprep.mubr.msk.bf16.mxu0 %vm4028_vm4, %v2896_v1 }
  0x61   : > { %2594 = vmatprep.mubr.msk.bf16.mxu1 %vm4028_vm4, %v2896_v1 }
  0x67   : > { %2543 = vmatmul.mubr.msk.bf16.gmra.mrb[32].mxu0 %vm3517_vm7, %v2134_v7 }
  0x68   : > { %2595 = vmatmul.mubr.msk.bf16.gmra.mrb[32].mxu1 %vm3517_vm7, %v2134_v7  ;;  %2614 = vmatprep.mubr.msk.bf16.mxu0 %vm4028_vm4, %v2896_v1 }
  0x6f   : > { %2615 = vmatmul.mubr.msk.bf16.vlgmr.msra.gmra.mrb[36].mxu0 %vm3130_vm2, %v3088_v59  ;;  %vm4065_vm2 = vnez %v4032_v62  ;;  %v1546_v59 = vld [vmem:[%s3968_s4] sm:$0xff] }
  0x70   : > { %2618 = vmatprep.mubr.msk.bf16.mxu0 %vm4028_vm4, %v2896_v1 }
  0x77   : > { %2619 = vmatmul.mubr.msk.bf16.gmra.mrb[40].mxu0 %vm3184_vm14, %v3143_v34  ;;  %vm4066_vm14 = vnez %v4039_v38  ;;  %v2736_v34 = vpack.c.bf16 %v1547_v27, %v1546_v59  ;;  %v1552_v38 = vld [vmem:[%s3968_s4 + $0x30] sm:$0xff] }
  0x78   : > { %2622 = vmatprep.mubr.msk.bf16.mxu0 %vm4028_vm4, %v2896_v1 }
  0x79   : > { %2737 = vmatprep.subr.bf16.mxu1 %v2736_v34 }
  0x7a   : > { %2739 = vmatpush3.bf16.msra.mxu1 %v2736_v34 }
  0x7f   : > { %2623 = vmatmul.mubr.msk.bf16.gmra.mrb[44].mxu0 %vm4064_vm0, %v3157_v40  ;;  %v1548_v40 = vld [vmem:[%s3968_s4 + $0x10] sm:$0xff]  ;;  %vm4075_vm0 = vnez %v4027_v36 }
  0x80   : > { %2626 = vmatprep.mubr.msk.bf16.mxu0 %vm4028_vm4, %v2896_v1  ;;  %v2740_v24 = vpack.c.bf16 %v1549_v52, %v1548_v40 }
  0x82   : > { %2741 = vmatprep.subr.bf16.mxu1 %v2740_v24 }
  0x83   : > { %2743 = vmatpush3.bf16.msra.mxu1 %v2740_v24 }
  0x87   : > { %2627 = vmatmul.mubr.msk.bf16.gmra.mrb[48].mxu0 %vm4065_vm2, %v3300_v55  ;;  %v1550_v55 = vld [vmem:[%s3968_s4 + $0x20] sm:$0xff]  ;;  %vm4076_vm2 = vnez %v4030_v41 }
  0x88   : > { %2630 = vmatprep.mubr.msk.bf16.mxu0 %vm4028_vm4, %v2896_v1 }
  0x8f   : > { %2631 = vmatmul.mubr.msk.bf16.gmra.mrb[52].mxu0 %vm4066_vm14, %v3302_v58  ;;  %v1551_v58 = vld [vmem:[%s3968_s4 + $0x28] sm:$0xff]  ;;  %vm4077_vm14 = vnez %v4035_v22 }
  0x90   : > { %2634 = vmatprep.mubr.msk.bf16.mxu0 %vm4028_vm4, %v2896_v1  ;;  %v2744_v62 = vpack.c.bf16 %v1551_v58, %v1550_v55 }
  0x92   : > { %2745 = vmatprep.subr.bf16.mxu1 %v2744_v62 }
  0x93   : > { %2747 = vmatpush3.bf16.msra.mxu1 %v2744_v62 }
  0x97   : > { %2635 = vmatmul.mubr.msk.bf16.gmra.mrb[56].mxu0 %vm4067_vm15, %v3391_v54  ;;  %v1553_v54 = vld [vmem:[%s3968_s4 + $0x38] sm:$0xff]  ;;  %vm4078_vm15 = vnez %v4037_v33 }
  0x98   : > { %2638 = vmatprep.mubr.msk.bf16.mxu0 %vm4028_vm4, %v2896_v1  ;;  %v2748_v56 = vpack.c.bf16 %v1553_v54, %v1552_v38 }
  0x9a   : > { %2749 = vmatprep.subr.bf16.mxu1 %v2748_v56 }
  0x9b   : > { %2751 = vmatpush3.bf16.msra.mxu1 %v2748_v56 }
  0x9c   : > { %2753 = vmatprep.subr.bf16.mxu1 %v2752_v48 }
  0x9f   : > { %2639 = vmatmul.mubr.msk.bf16.gmra.mrb[60].mxu0 %vm4068_vm10, %v3457_v63  ;;  %2755 = vmatpush3.bf16.msra.mxu1 %v2752_v48  ;;  %v1561_v63 = vld [vmem:[%s3968_s4 + $0x78] sm:$0xff]  ;;  %vm4079_vm10 = vnez %v4041_v53 }
  0xa0   : > { %2642 = vmatprep.mubr.msk.bf16.mxu0 %vm4028_vm4, %v2896_v1  ;;  %2757 = vmatprep.subr.bf16.mxu1 %v2756_v15  ;;  %v2764_v0 = vpack.c.bf16 %v1561_v63, %v1560_v57 }
  0xa3   : > { %2759 = vmatpush3.bf16.msra.mxu1 %v2756_v15 }
  0xa4   : > { %2761 = vmatprep.subr.bf16.mxu1 %v2760_v51 }
  0xa7   : > { %2643 = vmatmul.mubr.msk.bf16.gmra.mrb[64].mxu0 %vm3493_vm5, %v2131_v20  ;;  %2763 = vmatpush3.bf16.msra.mxu1 %v2760_v51  ;;  %vm4070_vm5 = vnez %v4011_v23 }
  0xa8   : > { %2646 = vmatprep.mubr.msk.bf16.mxu0 %vm4028_vm4, %v2896_v1  ;;  %2765 = vmatprep.subr.bf16.mxu1 %v2764_v0  ;;  %vm1328_vm4 = vcmp.lt.s32.totalorder %v2974_v6, 1 }
  0xab   : > { %2767 = vmatpush3.bf16.msra.mxu1 %v2764_v0 }
  0xaf   : > { %2647 = vmatmul.mubr.msk.bf16.gmra.mrb[68].mxu0 %vm3517_vm7, %v2134_v7  ;;  %vm4074_vm7 = vnez %v4023_v19 }
  0xfa   : > { %v3616_v60 = vpop.f32.mrb[0].mxu0 }
  0xfb   : > { %v2512_v4 = vpop.f32.mrb[1].mxu0  ;;  %v3618_v28 = vpop.f32.mrb[0].mxu1  ;;  %v1310_v47 = vrot.slane %v3616_v60, 7 }
  0xfc   : > { %v902_v46 = vpop.f32.mrb[2].mxu0  ;;  %v2564_v5 = vpop.f32.mrb[1].mxu1 }
  0xfd   : > { %v1311_v2 = vrot.slane %v902_v46, 7  ;;  %v2513_v3 = vpop.f32.mrb[3].mxu0  ;;  %v1072_v16 = vpop.f32.mrb[2].mxu1 }
  0xfe   : > { %v2565_v18 = vpop.f32.mrb[3].mxu1 }
  0xff   : > { %v1345_v7 = vsel %vm1328_vm4, %v1310_v47, %v1311_v2 }
 0x100   : > { %v3626_v9 = vadd.f32 %v1345_v7, %v1072_v16 }
 0x102   : > { %v907_v11 = vpop.f32.mrb[4].mxu0 }
 0x103   : > { %v1312_v10 = vrot.slane %v907_v11, 7  ;;  %v2516_v13 = vpop.f32.mrb[5].mxu0  ;;  %v1077_v12 = vpop.f32.mrb[4].mxu1 }
 0x104   : > { %v910_v20 = vpop.f32.mrb[6].mxu0  ;;  %v2568_v14 = vpop.f32.mrb[5].mxu1 }
 0x105   : > { %v1313_v25 = vrot.slane %v910_v20, 7  ;;  %v2517_v31 = vpop.f32.mrb[7].mxu0  ;;  %v1344_v59 = vsel %vm1328_vm4, %v1311_v2, %v1312_v10  ;;  %v1080_v27 = vpop.f32.mrb[6].mxu1 }
 0x106   : > { %v3630_v34 = vadd.f32 %v1344_v59, %v1077_v12  ;;  %v2569_v40 = vpop.f32.mrb[7].mxu1 }
 0x107   : > { %v1343_v52 = vsel %vm1328_vm4, %v1312_v10, %v1313_v25 }
 0x108   : > { %v3634_v24 = vadd.f32 %v1343_v52, %v1080_v27 }
 0x10a   : > { %v915_v55 = vpop.f32.mrb[8].mxu0 }
 0x10b   : > { %v1314_v58 = vrot.slane %v915_v55, 7  ;;  %v2520_v62 = vpop.f32.mrb[9].mxu0  ;;  %v1085_v38 = vpop.f32.mrb[8].mxu1 }
 0x10c   : > { %v918_v54 = vpop.f32.mrb[10].mxu0  ;;  %v2572_v56 = vpop.f32.mrb[9].mxu1 }
 0x10d   : > { %v1315_v32 = vrot.slane %v918_v54, 7  ;;  %v2521_v37 = vpop.f32.mrb[11].mxu0  ;;  %v1342_v48 = vsel %vm1328_vm4, %v1313_v25, %v1314_v58  ;;  %v1088_v42 = vpop.f32.mrb[10].mxu1 }
 0x10e   : > { %v3638_v44 = vadd.f32 %v1342_v48, %v1085_v38  ;;  %v2573_v15 = vpop.f32.mrb[11].mxu1 }
 0x10f   : > { %v1341_v50 = vsel %vm1328_vm4, %v1314_v58, %v1315_v32 }
 0x110   : > { %v3642_v39 = vadd.f32 %v1341_v50, %v1088_v42 }
 0x112   : > { %v923_v51 = vpop.f32.mrb[12].mxu0 }
 0x113   : > { %v1316_v57 = vrot.slane %v923_v51, 7  ;;  %v2524_v63 = vpop.f32.mrb[13].mxu0  ;;  %v1093_v0 = vpop.f32.mrb[12].mxu1 }
 0x114   : > { %v926_v4 = vpop.f32.mrb[14].mxu0  ;;  %v2576_v46 = vpop.f32.mrb[13].mxu1 }
 0x115   : > { %v1317_v5 = vrot.slane %v926_v4, 7  ;;  %v2525_v2 = vpop.f32.mrb[15].mxu0  ;;  %v1340_v3 = vsel %vm1328_vm4, %v1315_v32, %v1316_v57  ;;  %v1096_v16 = vpop.f32.mrb[14].mxu1 }
 0x116   : > { %v3646_v18 = vadd.f32 %v1340_v3, %v1093_v0  ;;  %v2577_v7 = vpop.f32.mrb[15].mxu1 }
 0x117   : > { %v1339_v11 = vsel %vm1328_vm4, %v1316_v57, %v1317_v5 }
 0x118   : > { %v3650_v10 = vadd.f32 %v1339_v11, %v1096_v16 }
 0x11a   : > { %v931_v13 = vpop.f32.mrb[16].mxu0 }
 0x11b   : > { %v1318_v12 = vrot.slane %v931_v13, 7  ;;  %v2528_v20 = vpop.f32.mrb[17].mxu0  ;;  %v1101_v14 = vpop.f32.mrb[16].mxu1 }
 0x11c   : > { %v934_v25 = vpop.f32.mrb[18].mxu0  ;;  %v2580_v31 = vpop.f32.mrb[17].mxu1 }
 0x11d   : > { %v1319_v59 = vrot.slane %v934_v25, 7  ;;  %v2529_v27 = vpop.f32.mrb[19].mxu0  ;;  %v1338_v40 = vsel %vm1328_vm4, %v1317_v5, %v1318_v12  ;;  %v1104_v52 = vpop.f32.mrb[18].mxu1 }
 0x11e   : > { %v3654_v55 = vadd.f32 %v1338_v40, %v1101_v14  ;;  %v2581_v58 = vpop.f32.mrb[19].mxu1 }
 0x11f   : > { %v1337_v62 = vsel %vm1328_vm4, %v1318_v12, %v1319_v59 }
 0x120   : > { %v3658_v38 = vadd.f32 %v1337_v62, %v1104_v52 }
 0x122   : > { %v939_v54 = vpop.f32.mrb[20].mxu0 }
 0x123   : > { %v1320_v56 = vrot.slane %v939_v54, 7  ;;  %v2532_v32 = vpop.f32.mrb[21].mxu0  ;;  %v1109_v37 = vpop.f32.mrb[20].mxu1 }
 0x124   : > { %v942_v48 = vpop.f32.mrb[22].mxu0  ;;  %v2584_v42 = vpop.f32.mrb[21].mxu1 }
 0x125   : > { %v1321_v15 = vrot.slane %v942_v48, 7  ;;  %v2533_v50 = vpop.f32.mrb[23].mxu0  ;;  %v1336_v51 = vsel %vm1328_vm4, %v1319_v59, %v1320_v56  ;;  %v1112_v57 = vpop.f32.mrb[22].mxu1 }
 0x126   : > { %v3662_v63 = vadd.f32 %v1336_v51, %v1109_v37  ;;  %v2585_v0 = vpop.f32.mrb[23].mxu1 }
 0x127   : > { %v1335_v4 = vsel %vm1328_vm4, %v1320_v56, %v1321_v15 }
 0x128   : > { %v3666_v46 = vadd.f32 %v1335_v4, %v1112_v57 }
 0x12a   : > { %v947_v5 = vpop.f32.mrb[24].mxu0 }
 0x12b   : > { %v1322_v2 = vrot.slane %v947_v5, 7  ;;  %v2536_v3 = vpop.f32.mrb[25].mxu0  ;;  %v1117_v16 = vpop.f32.mrb[24].mxu1 }
 0x12c   : > { %v950_v7 = vpop.f32.mrb[26].mxu0  ;;  %v2588_v11 = vpop.f32.mrb[25].mxu1 }
 0x12d   : > { %v1323_v13 = vrot.slane %v950_v7, 7  ;;  %v2537_v12 = vpop.f32.mrb[27].mxu0  ;;  %v1334_v20 = vsel %vm1328_vm4, %v1321_v15, %v1322_v2  ;;  %v1120_v14 = vpop.f32.mrb[26].mxu1 }
 0x12e   : > { %v3670_v25 = vadd.f32 %v1334_v20, %v1117_v16  ;;  %v2589_v31 = vpop.f32.mrb[27].mxu1 }
 0x12f   : > { %v1333_v59 = vsel %vm1328_vm4, %v1322_v2, %v1323_v13 }
 0x130   : > { %v3674_v27 = vadd.f32 %v1333_v59, %v1120_v14 }
 0x132   : > { %v955_v40 = vpop.f32.mrb[28].mxu0 }
 0x133   : > { %v1324_v52 = vrot.slane %v955_v40, 7  ;;  %v2540_v58 = vpop.f32.mrb[29].mxu0  ;;  %v1125_v62 = vpop.f32.mrb[28].mxu1 }
 0x134   : > { %v958_v54 = vpop.f32.mrb[30].mxu0  ;;  %v2592_v56 = vpop.f32.mrb[29].mxu1 }
 0x135   : > { %v1325_v32 = vrot.slane %v958_v54, 7  ;;  %v2541_v37 = vpop.f32.mrb[31].mxu0  ;;  %v1332_v48 = vsel %vm1328_vm4, %v1323_v13, %v1324_v52  ;;  %v1128_v42 = vpop.f32.mrb[30].mxu1 }
 0x136   : > { %v3678_v15 = vadd.f32 %v1332_v48, %v1125_v62  ;;  %v2593_v50 = vpop.f32.mrb[31].mxu1 }
 0x137   : > { %v1331_v51 = vsel %vm1328_vm4, %v1324_v52, %v1325_v32 }
 0x138   : > { %v3682_v57 = vadd.f32 %v1331_v51, %v1128_v42 }
 0x13a   : > { %v963_v0 = vpop.f32.mrb[32].mxu0 }
 0x13b   : > { %v1326_v4 = vrot.slane %v963_v0, 7  ;;  %v2544_v5 = vpop.f32.mrb[33].mxu0  ;;  %v1133_v2 = vpop.f32.mrb[32].mxu1 }
 0x13c   : > { %v966_v3 = vpop.f32.mrb[34].mxu0  ;;  %v2596_v16 = vpop.f32.mrb[33].mxu1 }
 0x13d   : > { %v1327_v7 = vrot.slane %v966_v3, 7  ;;  %v2545_v11 = vpop.f32.mrb[35].mxu0  ;;  %v1330_v13 = vsel %vm1328_vm4, %v1325_v32, %v1326_v4  ;;  %v1136_v12 = vpop.f32.mrb[34].mxu1 }
 0x13e   : > { %v3686_v20 = vadd.f32 %v1330_v13, %v1133_v2  ;;  %v2597_v14 = vpop.f32.mrb[35].mxu1 }
 0x13f   : > { %v1346_v31 = vsel %vm1328_vm4, %v1327_v7, %v1310_v47  ;;  %v1329_v59 = vsel %vm1328_vm4, %v1326_v4, %v1327_v7  ;;  %vm4080_vm4 = vnez %v4043_v61 }
 0x140   : > { %v1347_v40 = vadd.f32 %v1346_v31, %v3618_v28  ;;  %v3695_v52 = vadd.f32 %v1329_v59, %v1136_v12 }
 0x142   : > { %v3697_v58 = vpop.f32.mrb[36].mxu0 }
 0x143   : > { %v2616_v62 = vpop.f32.mrb[37].mxu0  ;;  %v1365_v56 = vrot.slane %v3697_v58, 1 }
 0x144   : > { %v1242_v54 = vpop.f32.mrb[38].mxu0 }
 0x145   : > { %v1366_v32 = vrot.slane %v1242_v54, 1  ;;  %v2617_v60 = vpop.f32.mrb[39].mxu0 }
 0x147   : > { %v1400_v47 = vsel %vm1383_vm3, %v1365_v56, %v1366_v32 }
 0x148   : > { %v1402_v37 = vadd.f32 %v1400_v47, %v1347_v40 }
 0x14a   : > { %v1420_v48 = vmax.f32 %v1402_v37, 0.0  ;;  %v1247_v28 = vpop.f32.mrb[40].mxu0 }
 0x14b   : > { %v1367_v42 = vrot.slane %v1247_v28, 1  ;;  %v2620_v50 = vpop.f32.mrb[41].mxu0 }
 0x14c   : > { %v1438_v51 = vmin.f32 %v1420_v48, 1.0  ;;  %v1250_v0 = vpop.f32.mrb[42].mxu0 }
 0x14d   : > { %v1399_v4 = vsel %vm1383_vm3, %v1366_v32, %v1367_v42  ;;  %v1368_v5 = vrot.slane %v1250_v0, 1  ;;  %v2621_v2 = vpop.f32.mrb[43].mxu0 }
 0x14e   : > { %v1456_v3 = vmul.f32 15.0, %v1438_v51  ;;  %v1403_v16 = vadd.f32 %v1399_v4, %v3626_v9 }
 0x14f   : > { %v1398_v7 = vsel %vm1383_vm3, %v1367_v42, %v1368_v5 }
 0x150   : > { %v1421_v11 = vmax.f32 %v1403_v16, 0.0  ;;  %v1404_v13 = vadd.f32 %v1398_v7, %v3630_v34  ;;  %v2804_v12 = vround.rtne.f32 %v1456_v3 }
 0x152   : > { %v1439_v14 = vmin.f32 %v1421_v11, 1.0  ;;  %v1422_v31 = vmax.f32 %v1404_v13, 0.0  ;;  %v1255_v59 = vpop.f32.mrb[44].mxu0  ;;  %v1492_v40 = vmul.f32 0.06666667, %v2804_v12 }
 0x153   : > { %v1369_v62 = vrot.slane %v1255_v59, 1  ;;  %v2624_v54 = vpop.f32.mrb[45].mxu0 }
 0x154   : > { %v1457_v60 = vmul.f32 15.0, %v1439_v14  ;;  %v1440_v32 = vmin.f32 %v1422_v31, 1.0  ;;  %v1258_v47 = vpop.f32.mrb[46].mxu0  ;;  %2682 = vmatprep.mubr.msk.f32.mxu1 %vm4069_vm12, %v1492_v40  ;;  %v3721_v3 = vsel %vm4069_vm12, %v1492_v40, 0.0  ;;  %vm4081_vm12 = vnez %v4047_v35 }
 0x155   : > { %v1397_v9 = vsel %vm1383_vm3, %v1368_v5, %v1369_v62  ;;  %v1370_v37 = vrot.slane %v1258_v47, 1  ;;  %v2625_v48 = vpop.f32.mrb[47].mxu0 }
 0x156   : > { %v2805_v34 = vround.rtne.f32 %v1457_v60  ;;  %v1458_v28 = vmul.f32 15.0, %v1440_v32  ;;  %v1405_v42 = vadd.f32 %v1397_v9, %v3634_v24 }
 0x157   : > { %v1396_v50 = vsel %vm1383_vm3, %v1369_v62, %v1370_v37 }
 0x158   : > { %v1493_v51 = vmul.f32 0.06666667, %v2805_v34  ;;  %v1423_v0 = vmax.f32 %v1405_v42, 0.0  ;;  %v1406_v4 = vadd.f32 %v1396_v50, %v3638_v44  ;;  %v2806_v2 = vround.rtne.f32 %v1458_v28 }
 0x15a   : > { %v1441_v5 = vmin.f32 %v1423_v0, 1.0  ;;  %v1424_v16 = vmax.f32 %v1406_v4, 0.0  ;;  %v1263_v7 = vpop.f32.mrb[48].mxu0  ;;  %2683 = vmatmul.mubr.msk.f32.vlgmr.msra.gmra.mrb[36].mxu1 %vm4070_vm5, %v1493_v51  ;;  %v1494_v11 = vmul.f32 0.06666667, %v2806_v2  ;;  %v3734_v24 = vsel %vm4070_vm5, %v1493_v51, 0.0 }
 0x15b   : > { %v1371_v21 = vrot.slane %v1263_v7, 1  ;;  %v2628_v44 = vpop.f32.mrb[49].mxu0  ;;  %v2333_v13 = vpack.c.bf16 %v3734_v24, %v3721_v3  ;;  %vm4082_vm5 = vnez %v4049_v43  ;;  %v1529_v29 = vmul.f32 %v3734_v24, %v3734_v24 }
 0x15c   : > { %v1459_v12 = vmul.f32 15.0, %v1441_v5  ;;  %v1442_v14 = vmin.f32 %v1424_v16, 1.0  ;;  %v1266_v31 = vpop.f32.mrb[50].mxu0  ;;  %2685 = vmatprep.mubr.msk.f32.mxu1 %vm4071_vm6, %v1494_v11  ;;  %v3749_v28 = vsel %vm4071_vm6, %v1494_v11, 0.0 }
 0x15d   : > { %v1395_v59 = vsel %vm1383_vm3, %v1370_v37, %v1371_v21  ;;  %v1372_v40 = vrot.slane %v1266_v31, 1  ;;  %v2629_v62 = vpop.f32.mrb[51].mxu0  ;;  %2334 = vst [vmem:[%s3730_s25] sm:$0xff] %v2333_v13  }
 0x15e   : > { %v1460_v23 = vmul.f32 15.0, %v1442_v14  ;;  %v1407_v54 = vadd.f32 %v1395_v59, %v3642_v39  ;;  %v2807_v60 = vround.rtne.f32 %v1459_v12 }
 0x15f   : > { %v1394_v32 = vsel %vm1383_vm3, %v1371_v21, %v1372_v40 }
 0x160   : > { %v1425_v47 = vmax.f32 %v1407_v54, 0.0  ;;  %v1408_v9 = vadd.f32 %v1394_v32, %v3646_v18  ;;  %v1495_v48 = vmul.f32 0.06666667, %v2807_v60  ;;  %v2808_v34 = vround.rtne.f32 %v1460_v23 }
 0x162   : > { %v1443_v37 = vmin.f32 %v1425_v47, 1.0  ;;  %v1426_v42 = vmax.f32 %v1408_v9, 0.0  ;;  %v1271_v50 = vpop.f32.mrb[52].mxu0  ;;  %2686 = vmatmul.mubr.msk.f32.gmra.mrb[38].mxu1 %vm4072_vm11, %v1495_v48  ;;  %v1496_v39 = vmul.f32 0.06666667, %v2808_v34  ;;  %v3755_v51 = vsel %vm4072_vm11, %v1495_v48, 0.0 }
 0x163   : > { %v1373_v0 = vrot.slane %v1271_v50, 1  ;;  %v2632_v18 = vpop.f32.mrb[53].mxu0  ;;  %v2338_v4 = vpack.c.bf16 %v3755_v51, %v3749_v28  ;;  %v1531_v26 = vmul.f32 %v3755_v51, %v3755_v51 }
 0x164   : > { %v1461_v45 = vmul.f32 15.0, %v1443_v37  ;;  %v1444_v2 = vmin.f32 %v1426_v42, 1.0  ;;  %v1274_v5 = vpop.f32.mrb[54].mxu0  ;;  %2688 = vmatprep.mubr.msk.f32.mxu1 %vm4073_vm13, %v1496_v39  ;;  %v3770_v62 = vsel %vm4073_vm13, %v1496_v39, 0.0 }
 0x165   : > { %v1393_v16 = vsel %vm1383_vm3, %v1372_v40, %v1373_v0  ;;  %v1374_v7 = vrot.slane %v1274_v5, 1  ;;  %v2633_v11 = vpop.f32.mrb[55].mxu0  ;;  %2383 = vst [vmem:[%s3730_s25 + $0x8] sm:$0xff] %v2338_v4  }
 0x166   : > { %v1462_v49 = vmul.f32 15.0, %v1444_v2  ;;  %v1409_v21 = vadd.f32 %v1393_v16, %v3650_v10  ;;  %v2809_v44 = vround.rtne.f32 %v1461_v45 }
 0x167   : > { %v1392_v13 = vsel %vm1383_vm3, %v1373_v0, %v1374_v7 }
 0x168   : > { %v1427_v12 = vmax.f32 %v1409_v21, 0.0  ;;  %v1410_v14 = vadd.f32 %v1392_v13, %v3654_v55  ;;  %v1497_v31 = vmul.f32 0.06666667, %v2809_v44  ;;  %v2810_v59 = vround.rtne.f32 %v1462_v49 }
 0x16a   : > { %v1445_v40 = vmin.f32 %v1427_v12, 1.0  ;;  %v1428_v23 = vmax.f32 %v1410_v14, 0.0  ;;  %v1279_v54 = vpop.f32.mrb[56].mxu0  ;;  %2689 = vmatmul.mubr.msk.f32.gmra.mrb[40].mxu1 %vm4074_vm7, %v1497_v31  ;;  %v1498_v10 = vmul.f32 0.06666667, %v2810_v59  ;;  %v3776_v60 = vsel %vm4074_vm7, %v1497_v31, 0.0 }
 0x16b   : > { %v1375_v32 = vrot.slane %v1279_v54, 1  ;;  %v2636_v55 = vpop.f32.mrb[57].mxu0  ;;  %v2343_v47 = vpack.c.bf16 %v3776_v60, %v3770_v62  ;;  %v1533_v30 = vmul.f32 %v3776_v60, %v3776_v60 }
 0x16c   : > { %v1463_v17 = vmul.f32 15.0, %v1445_v40  ;;  %v1446_v9 = vmin.f32 %v1428_v23, 1.0  ;;  %v1282_v48 = vpop.f32.mrb[58].mxu0  ;;  %2691 = vmatprep.mubr.msk.f32.mxu1 %vm4075_vm0, %v1498_v10  ;;  %v3791_v5 = vsel %vm4075_vm0, %v1498_v10, 0.0 }
 0x16d   : > { %v1391_v34 = vsel %vm1383_vm3, %v1374_v7, %v1375_v32  ;;  %v1376_v37 = vrot.slane %v1282_v48, 1  ;;  %v2637_v42 = vpop.f32.mrb[59].mxu0  ;;  %2384 = vst [vmem:[%s3730_s25 + $0x10] sm:$0xff] %v2343_v47  }
 0x16e   : > { %v1464_v19 = vmul.f32 15.0, %v1446_v9  ;;  %v1411_v50 = vadd.f32 %v1391_v34, %v3658_v38  ;;  %v2811_v39 = vround.rtne.f32 %v1463_v17 }
 0x16f   : > { %v1390_v0 = vsel %vm1383_vm3, %v1375_v32, %v1376_v37 }
 0x170   : > { %v1429_v18 = vmax.f32 %v1411_v50, 0.0  ;;  %v1412_v4 = vadd.f32 %v1390_v0, %v3662_v63  ;;  %v1499_v45 = vmul.f32 0.06666667, %v2811_v39  ;;  %v2812_v2 = vround.rtne.f32 %v1464_v19 }
 0x172   : > { %v1447_v16 = vmin.f32 %v1429_v18, 1.0  ;;  %v1430_v7 = vmax.f32 %v1412_v4, 0.0  ;;  %v1287_v11 = vpop.f32.mrb[60].mxu0  ;;  %2692 = vmatmul.mubr.msk.f32.gmra.mrb[42].mxu1 %vm4076_vm2, %v1499_v45  ;;  %v1500_v38 = vmul.f32 0.06666667, %v2812_v2  ;;  %v3797_v49 = vsel %vm4076_vm2, %v1499_v45, 0.0 }
 0x173   : > { %v1377_v21 = vrot.slane %v1287_v11, 1  ;;  %v2640_v63 = vpop.f32.mrb[61].mxu0  ;;  %v2348_v44 = vpack.c.bf16 %v3797_v49, %v3791_v5  ;;  %v1535_v24 = vmul.f32 %v3797_v49, %v3797_v49 }
 0x174   : > { %v1465_v36 = vmul.f32 15.0, %v1447_v16  ;;  %v1448_v13 = vmin.f32 %v1430_v7, 1.0  ;;  %v1290_v12 = vpop.f32.mrb[62].mxu0  ;;  %2694 = vmatprep.mubr.msk.f32.mxu1 %vm4077_vm14, %v1500_v38  ;;  %v3812_v17 = vsel %vm4077_vm14, %v1500_v38, 0.0 }
 0x175   : > { %v1389_v14 = vsel %vm1383_vm3, %v1376_v37, %v1377_v21  ;;  %v1378_v31 = vrot.slane %v1290_v12, 1  ;;  %v2641_v59 = vpop.f32.mrb[63].mxu0  ;;  %2385 = vst [vmem:[%s3730_s25 + $0x18] sm:$0xff] %v2348_v44  }
 0x176   : > { %v1466_v41 = vmul.f32 15.0, %v1448_v13  ;;  %v1413_v40 = vadd.f32 %v1389_v14, %v3666_v46  ;;  %v2813_v23 = vround.rtne.f32 %v1465_v36 }
 0x177   : > { %v1388_v54 = vsel %vm1383_vm3, %v1377_v21, %v1378_v31 }
 0x178   : > { %v1431_v10 = vmax.f32 %v1413_v40, 0.0  ;;  %v1414_v32 = vadd.f32 %v1388_v54, %v3670_v25  ;;  %v1501_v55 = vmul.f32 0.06666667, %v2813_v23  ;;  %v2814_v47 = vround.rtne.f32 %v1466_v41 }
 0x17a   : > { %v1449_v9 = vmin.f32 %v1431_v10, 1.0  ;;  %v1432_v48 = vmax.f32 %v1414_v32, 0.0  ;;  %v1295_v34 = vpop.f32.mrb[64].mxu0  ;;  %2695 = vmatmul.mubr.msk.f32.gmra.mrb[44].mxu1 %vm4078_vm15, %v1501_v55  ;;  %v1502_v46 = vmul.f32 0.06666667, %v2814_v47  ;;  %v3818_v37 = vsel %vm4078_vm15, %v1501_v55, 0.0 }
 0x17b   : > { %v1379_v42 = vrot.slane %v1295_v34, 1  ;;  %v2644_v25 = vpop.f32.mrb[65].mxu0  ;;  %v2353_v19 = vpack.c.bf16 %v3818_v37, %v3812_v17  ;;  %v1537_v51 = vmul.f32 %v3818_v37, %v3818_v37 }
 0x17c   : > { %v1467_v22 = vmul.f32 15.0, %v1449_v9  ;;  %v1450_v50 = vmin.f32 %v1432_v48, 1.0  ;;  %v1298_v39 = vpop.f32.mrb[66].mxu0  ;;  %2697 = vmatprep.mubr.msk.f32.mxu1 %vm4079_vm10, %v1502_v46  ;;  %v3833_v63 = vsel %vm4079_vm10, %v1502_v46, 0.0 }
 0x17d   : > { %v1387_v0 = vsel %vm1383_vm3, %v1378_v31, %v1379_v42  ;;  %v1380_v18 = vrot.slane %v1298_v39, 1  ;;  %v2645_v4 = vpop.f32.mrb[67].mxu0  ;;  %2386 = vst [vmem:[%s3730_s25 + $0x20] sm:$0xff] %v2353_v19  }
 0x17e   : > { %v1468_v33 = vmul.f32 15.0, %v1450_v50  ;;  %v1415_v45 = vadd.f32 %v1387_v0, %v3674_v27  ;;  %v2815_v2 = vround.rtne.f32 %v1467_v22 }
 0x17f   : > { %v1386_v16 = vsel %vm1383_vm3, %v1379_v42, %v1380_v18 }
 0x180   : > { %v1433_v7 = vmax.f32 %v1415_v45, 0.0  ;;  %v1416_v11 = vadd.f32 %v1386_v16, %v3678_v15  ;;  %v1503_v38 = vmul.f32 0.06666667, %v2815_v2  ;;  %v2816_v21 = vround.rtne.f32 %v1468_v33 }
 0x182   : > { %v1451_v44 = vmin.f32 %v1433_v7, 1.0  ;;  %v1434_v36 = vmax.f32 %v1416_v11, 0.0  ;;  %v1303_v13 = vpop.f32.mrb[68].mxu0  ;;  %2698 = vmatmul.mubr.msk.f32.gmra.mrb[46].mxu1 %vm4080_vm4, %v1503_v38  ;;  %v1504_v27 = vmul.f32 0.06666667, %v2816_v21  ;;  %v3839_v12 = vsel %vm4080_vm4, %v1503_v38, 0.0 }
 0x183   : > { %v1381_v14 = vrot.slane %v1303_v13, 1  ;;  %v2648_v15 = vpop.f32.mrb[69].mxu0  ;;  %v2358_v31 = vpack.c.bf16 %v3839_v12, %v3833_v63  ;;  %v1528_v21 = vmul.f32 %v3721_v3, %v3721_v3  ;;  %v1532_v3 = vmul.f32 %v3770_v62, %v3770_v62 }
 0x184   : > { %v1469_v53 = vmul.f32 15.0, %v1451_v44  ;;  %v1452_v59 = vmin.f32 %v1434_v36, 1.0  ;;  %v1306_v41 = vpop.f32.mrb[70].mxu0  ;;  %2700 = vmatprep.mubr.msk.f32.mxu1 %vm4081_vm12, %v1504_v27  ;;  %v1534_v36 = vmul.f32 %v3791_v5, %v3791_v5  ;;  %v1538_v62 = vmul.f32 %v3833_v63, %v3833_v63 }
 0x185   : > { %v1385_v40 = vsel %vm1383_vm3, %v1380_v18, %v1381_v14  ;;  %v1382_v23 = vrot.slane %v1306_v41, 1  ;;  %v2649_v54 = vpop.f32.mrb[71].mxu0  ;;  %2387 = vst [vmem:[%s3730_s25 + $0x28] sm:$0xff] %v2358_v31   ;;  %v1539_v60 = vmul.f32 %v3839_v12, %v3839_v12 }
 0x186   : > { %v1470_v61 = vmul.f32 15.0, %v1452_v59  ;;  %v1417_v10 = vadd.f32 %v1385_v40, %v3682_v57  ;;  %v2817_v32 = vround.rtne.f32 %v1469_v53  ;;  %v1522_v57 = vsel %vm4081_vm12, %v1504_v27, 0.0 }
 0x187   : > { %v1384_v55 = vsel %vm1383_vm3, %v1381_v14, %v1382_v23  ;;  %v1401_v47 = vsel %vm1383_vm3, %v1382_v23, %v1365_v56  ;;  %vm4083_vm3 = vnez %v4055_v8  ;;  %v1530_v8 = vmul.f32 %v3749_v28, %v3749_v28 }
 0x188   : > { %v1435_v9 = vmax.f32 %v1417_v10, 0.0  ;;  %v1418_v48 = vadd.f32 %v1384_v55, %v3686_v20  ;;  %v1419_v34 = vadd.f32 %v1401_v47, %v3695_v52  ;;  %v1505_v46 = vmul.f32 0.06666667, %v2817_v32 }
 0x189   : > { %v2818_v42 = vround.rtne.f32 %v1470_v61  ;;  %v1536_v28 = vmul.f32 %v3812_v17, %v3812_v17  ;;  %v1540_v5 = vmul.f32 %v1522_v57, %v1522_v57 }
 0x18a   : > { %v1453_v25 = vmin.f32 %v1435_v9, 1.0  ;;  %v1436_v19 = vmax.f32 %v1418_v48, 0.0  ;;  %v1437_v22 = vmax.f32 %v1419_v34, 0.0  ;;  %2701 = vmatmul.mubr.msk.f32.gmra.mrb[48].mxu1 %vm4082_vm5, %v1505_v46  ;;  %v1523_v6 = vsel %vm4082_vm5, %v1505_v46, 0.0 }
 0x18b   : > { %v1506_v58 = vmul.f32 0.06666667, %v2818_v42  ;;  %v2363_v56 = vpack.c.bf16 %v1523_v6, %v1522_v57  ;;  %v1541_v49 = vmul.f32 %v1523_v6, %v1523_v6 }
 0x18c   : > { %v1471_v20 = vmul.f32 15.0, %v1453_v25  ;;  %v1454_v50 = vmin.f32 %v1436_v19, 1.0  ;;  %v1455_v39 = vmin.f32 %v1437_v22, 1.0 }
 0x18d   : > { %2703 = vmatprep.mubr.msk.f32.mxu1 %vm3479_vm9, %v1506_v58  ;;  %2388 = vst [vmem:[%s3730_s25 + $0x30] sm:$0xff] %v2363_v56   ;;  %v1524_v2 = vsel %vm3479_vm9, %v1506_v58, 0.0  ;;  %vm1807_vm9 = vcmask 64512  }
 0x18e   : > { %v1472_v35 = vmul.f32 15.0, %v1454_v50  ;;  %v1473_v52 = vmul.f32 15.0, %v1455_v39  ;;  %v2819_v0 = vround.rtne.f32 %v1471_v20  ;;  %v1542_v17 = vmul.f32 %v1524_v2, %v1524_v2 }
 0x190   : > { %v1507_v18 = vmul.f32 0.06666667, %v2819_v0  ;;  %v2820_v4 = vround.rtne.f32 %v1472_v35  ;;  %v2821_v33 = vround.rtne.f32 %v1473_v52 }
 0x192   : > { %2704 = vmatmul.mubr.msk.f32.gmra.mrb[50].mxu1 %vm4083_vm3, %v1507_v18  ;;  %v1508_v43 = vmul.f32 0.06666667, %v2820_v4  ;;  %v1509_v45 = vmul.f32 0.06666667, %v2821_v33  ;;  %v1525_v16 = vsel %vm4083_vm3, %v1507_v18, 0.0 }
 0x193   : > { %v2368_v7 = vpack.c.bf16 %v1525_v16, %v1524_v2  ;;  %v1543_v13 = vmul.f32 %v1525_v16, %v1525_v16 }
 0x194   : > { %2706 = vmatprep.mubr.msk.f32.mxu1 %vm3503_vm1, %v1508_v43  ;;  %v1526_v11 = vsel %vm3503_vm1, %v1508_v43, 0.0  ;;  %v1527_v38 = vsel %vm3507_vm8, %v1509_v45, 0.0  ;;  %vm1894_vm1 = vcmask 58368  }
 0x195   : > { %2389 = vst [vmem:[%s3730_s25 + $0x38] sm:$0xff] %v2368_v7   ;;  %v2373_v44 = vpack.c.bf16 %v1527_v38, %v1526_v11  ;;  %v1544_v27 = vmul.f32 %v1526_v11, %v1526_v11  ;;  %v1545_v37 = vmul.f32 %v1527_v38, %v1527_v38  ;;  %1895 = vst.msk [vmem:[%s3911_s27] sm:$0x3] %vm1894_vm1, %v2896_v1 }
 0x196   : > { %2707 = vmatmul.mubr.msk.f32.gmra.mrb[52].mxu1 %vm3507_vm8, %v1509_v45  ;;  %vm1897_vm8 = vcmask 1040384  }
 0x197   : > { %2709 = vmatprep.mubr.f32.mxu1 %v1528_v21  ;;  %2390 = vst [vmem:[%s3730_s25 + $0x40] sm:$0xff] %v2373_v44  }
 0x19a   : > { %2710 = vmatmul.mubr.f32.gmra.mrb[54].mxu1 %v1529_v29 }
 0x19b   : > { %2712 = vmatprep.mubr.f32.mxu1 %v1530_v8 }
 0x19e   : > { %2713 = vmatmul.mubr.f32.gmra.mrb[56].mxu1 %v1531_v26 }
 0x19f   : > { %2715 = vmatprep.mubr.f32.mxu1 %v1532_v3 }
 0x1a2   : > { %2716 = vmatmul.mubr.f32.gmra.mrb[58].mxu1 %v1533_v30 }
 0x1a3   : > { %2718 = vmatprep.mubr.f32.mxu1 %v1534_v36 }
 0x1a6   : > { %2719 = vmatmul.mubr.f32.gmra.mrb[60].mxu1 %v1535_v24 }
 0x1a7   : > { %2721 = vmatprep.mubr.f32.mxu1 %v1536_v28 }
 0x1aa   : > { %2722 = vmatmul.mubr.f32.gmra.mrb[62].mxu1 %v1537_v51 }
 0x1ab   : > { %2724 = vmatprep.mubr.f32.mxu1 %v1538_v62 }
 0x1ae   : > { %2725 = vmatmul.mubr.f32.gmra.mrb[64].mxu1 %v1539_v60 }
 0x1af   : > { %2727 = vmatprep.mubr.f32.mxu1 %v1540_v5 }
 0x1b2   : > { %2728 = vmatmul.mubr.f32.gmra.mrb[66].mxu1 %v1541_v49 }
 0x1b3   : > { %2730 = vmatprep.mubr.f32.mxu1 %v1542_v17 }
 0x1b6   : > { %2731 = vmatmul.mubr.f32.gmra.mrb[68].mxu1 %v1543_v13 }
 0x1b7   : > { %2733 = vmatprep.mubr.f32.mxu1 %v1544_v27 }
 0x1ba   : > { %2734 = vmatmul.mubr.f32.gmra.mrb[70].mxu1 %v1545_v37 }
 0x22d   : > { %v2684_v63 = vpop.f32.mrb[36].mxu1 }
 0x22e   : > { %v1809_v12 = vsel %vm1807_vm9, %v2684_v63, 0.0  ;;  %v1628_v14 = vpop.f32.mrb[37].mxu1 }
 0x22f   : > { %v1808_v15 = vsel %vm1807_vm9, %v1628_v14, 0.0 }
 0x230   : > { %v1810_v31 = vadd.f32 %v1809_v12, %v1808_v15 }
 0x235   : > { %v2687_v53 = vpop.f32.mrb[38].mxu1 }
 0x236   : > { %v1638_v59 = vpop.f32.mrb[39].mxu1  ;;  %v1813_v23 = vsel %vm1807_vm9, %v2687_v53, 0.0 }
 0x237   : > { %v1811_v41 = vsel %vm1807_vm9, %v1638_v59, 0.0 }
 0x238   : > { %v1812_v40 = vadd.f32 %v1811_v41, %v1810_v31 }
 0x23a   : > { %v1814_v54 = vadd.f32 %v1813_v23, %v1812_v40 }
 0x23d   : > { %v2690_v61 = vpop.f32.mrb[40].mxu1 }
 0x23e   : > { %v1648_v10 = vpop.f32.mrb[41].mxu1  ;;  %v1817_v55 = vsel %vm1807_vm9, %v2690_v61, 0.0 }
 0x23f   : > { %v1815_v1 = vsel %vm1807_vm9, %v1648_v10, 0.0 }
 0x240   : > { %v1816_v32 = vadd.f32 %v1815_v1, %v1814_v54 }
 0x242   : > { %v1818_v47 = vadd.f32 %v1817_v55, %v1816_v32 }
 0x245   : > { %v2693_v9 = vpop.f32.mrb[42].mxu1 }
 0x246   : > { %v1658_v48 = vpop.f32.mrb[43].mxu1  ;;  %v1821_v42 = vsel %vm1807_vm9, %v2693_v9, 0.0 }
 0x247   : > { %v1819_v34 = vsel %vm1807_vm9, %v1658_v48, 0.0 }
 0x248   : > { %v1820_v46 = vadd.f32 %v1819_v34, %v1818_v47 }
 0x24a   : > { %v1822_v57 = vadd.f32 %v1821_v42, %v1820_v46 }
 0x24d   : > { %v2696_v25 = vpop.f32.mrb[44].mxu1 }
 0x24e   : > { %v1668_v19 = vpop.f32.mrb[45].mxu1  ;;  %v1825_v58 = vsel %vm1807_vm9, %v2696_v25, 0.0 }
 0x24f   : > { %v1823_v22 = vsel %vm1807_vm9, %v1668_v19, 0.0 }
 0x250   : > { %v1824_v6 = vadd.f32 %v1823_v22, %v1822_v57 }
 0x252   : > { %v1826_v56 = vadd.f32 %v1825_v58, %v1824_v6 }
 0x255   : > { %v2699_v20 = vpop.f32.mrb[46].mxu1 }
 0x256   : > { %v1678_v50 = vpop.f32.mrb[47].mxu1  ;;  %v1829_v52 = vsel %vm1807_vm9, %v2699_v20, 0.0 }
 0x257   : > { %v1827_v39 = vsel %vm1807_vm9, %v1678_v50, 0.0 }
 0x258   : > { %v1828_v35 = vadd.f32 %v1827_v39, %v1826_v56 }
 0x25a   : > { %v1830_v0 = vadd.f32 %v1829_v52, %v1828_v35 }
 0x25d   : > { %v2702_v18 = vpop.f32.mrb[48].mxu1 }
 0x25e   : > { %v1688_v4 = vpop.f32.mrb[49].mxu1  ;;  %v1833_v45 = vsel %vm1807_vm9, %v2702_v18, 0.0 }
 0x25f   : > { %v1831_v33 = vsel %vm1807_vm9, %v1688_v4, 0.0 }
 0x260   : > { %v1832_v43 = vadd.f32 %v1831_v33, %v1830_v0 }
 0x262   : > { %v1834_v2 = vadd.f32 %v1833_v45, %v1832_v43 }
 0x265   : > { %v2705_v16 = vpop.f32.mrb[50].mxu1 }
 0x266   : > { %v1698_v7 = vpop.f32.mrb[51].mxu1  ;;  %v1837_v21 = vsel %vm1807_vm9, %v2705_v16, 0.0 }
 0x267   : > { %v1835_v11 = vsel %vm1807_vm9, %v1698_v7, 0.0 }
 0x268   : > { %v1836_v38 = vadd.f32 %v1835_v11, %v1834_v2 }
 0x269   : > { %v2708_v44 = vpop.f32.mrb[52].mxu1 }
 0x26a   : > { %v1708_v29 = vpop.f32.mrb[53].mxu1  ;;  %v1838_v8 = vadd.f32 %v1837_v21, %v1836_v38  ;;  %v1841_v30 = vsel %vm1807_vm9, %v2708_v44, 0.0 }
 0x26b   : > { %v1839_v26 = vsel %vm1807_vm9, %v1708_v29, 0.0 }
 0x26c   : > { %v1840_v3 = vadd.f32 %v1839_v26, %v1838_v8 }
 0x26d   : > { %v2711_v36 = vpop.f32.mrb[54].mxu1 }
 0x26e   : > { %v1842_v24 = vadd.f32 %v1841_v30, %v1840_v3  ;;  %v1850_v28 = vsel %vm1807_vm9, %v2711_v36, 0.0  ;;  %v1718_v51 = vpop.f32.mrb[55].mxu1 }
 0x26f   : > { %v1849_v62 = vsel %vm1807_vm9, %v1718_v51, 0.0 }
 0x270   : > { %v1851_v60 = vadd.f32 %v1850_v28, %v1849_v62  ;;  %v1843_v50 = vrot.slane %v1842_v24, 4  ;;  %v1896_v28 = vld [vmem:[%s3911_s27] sm:$0x3] }
 0x271   : > { %v2714_v5 = vpop.f32.mrb[56].mxu1 }
 0x272   : > { %v1728_v49 = vpop.f32.mrb[57].mxu1  ;;  %v1854_v27 = vsel %vm1807_vm9, %v2714_v5, 0.0  ;;  %v1844_v33 = vadd.f32 %v1843_v50, %v1842_v24 }
 0x273   : > { %v1852_v17 = vsel %vm1807_vm9, %v1728_v49, 0.0 }
 0x274   : > { %v1853_v13 = vadd.f32 %v1852_v17, %v1851_v60  ;;  %v1845_v11 = vrot.slane %v1844_v33, 2 }
 0x275   : > { %v2717_v37 = vpop.f32.mrb[58].mxu1 }
 0x276   : > { %v1738_v63 = vpop.f32.mrb[59].mxu1  ;;  %v1855_v12 = vadd.f32 %v1854_v27, %v1853_v13  ;;  %v1858_v31 = vsel %vm1807_vm9, %v2717_v37, 0.0  ;;  %v1846_v44 = vadd.f32 %v1845_v11, %v1844_v33 }
 0x277   : > { %v1856_v14 = vsel %vm1807_vm9, %v1738_v63, 0.0 }
 0x278   : > { %v1857_v15 = vadd.f32 %v1856_v14, %v1855_v12  ;;  %v1847_v26 = vrot.slane %v1846_v44, 1 }
 0x279   : > { %v2720_v53 = vpop.f32.mrb[60].mxu1 }
 0x27a   : > { %v1748_v59 = vpop.f32.mrb[61].mxu1  ;;  %v1859_v41 = vadd.f32 %v1858_v31, %v1857_v15  ;;  %v1862_v54 = vsel %vm1807_vm9, %v2720_v53, 0.0  ;;  %v1848_v36 = vadd.f32 %v1847_v26, %v1846_v44 }
 0x27b   : > { %v1860_v40 = vsel %vm1807_vm9, %v1748_v59, 0.0 }
 0x27c   : > { %v1861_v23 = vadd.f32 %v1860_v40, %v1859_v41 }
 0x27d   : > { %v2723_v61 = vpop.f32.mrb[62].mxu1 }
 0x27e   : > { %v1758_v10 = vpop.f32.mrb[63].mxu1  ;;  %v1863_v1 = vadd.f32 %v1862_v54, %v1861_v23  ;;  %v1866_v47 = vsel %vm1807_vm9, %v2723_v61, 0.0 }
 0x27f   : > { %v1864_v32 = vsel %vm1807_vm9, %v1758_v10, 0.0 }
 0x280   : > { %v1865_v55 = vadd.f32 %v1864_v32, %v1863_v1 }
 0x281   : > { %v2726_v9 = vpop.f32.mrb[64].mxu1 }
 0x282   : > { %v1768_v48 = vpop.f32.mrb[65].mxu1  ;;  %v1867_v34 = vadd.f32 %v1866_v47, %v1865_v55  ;;  %v1870_v57 = vsel %vm1807_vm9, %v2726_v9, 0.0 }
 0x283   : > { %v1868_v46 = vsel %vm1807_vm9, %v1768_v48, 0.0 }
 0x284   : > { %v1869_v42 = vadd.f32 %v1868_v46, %v1867_v34 }
 0x285   : > { %v2729_v25 = vpop.f32.mrb[66].mxu1 }
 0x286   : > { %v1778_v19 = vpop.f32.mrb[67].mxu1  ;;  %v1871_v22 = vadd.f32 %v1870_v57, %v1869_v42  ;;  %v1874_v56 = vsel %vm1807_vm9, %v2729_v25, 0.0 }
 0x287   : > { %v1872_v6 = vsel %vm1807_vm9, %v1778_v19, 0.0 }
 0x288   : > { %v1873_v58 = vadd.f32 %v1872_v6, %v1871_v22 }
 0x289   : > { %v2732_v20 = vpop.f32.mrb[68].mxu1 }
 0x28a   : > { %v1788_v39 = vpop.f32.mrb[69].mxu1  ;;  %v1875_v35 = vadd.f32 %v1874_v56, %v1873_v58  ;;  %v1878_v18 = vsel %vm1807_vm9, %v2732_v20, 0.0 }
 0x28b   : > { %v1876_v52 = vsel %vm1807_vm9, %v1788_v39, 0.0 }
 0x28c   : > { %v1877_v0 = vadd.f32 %v1876_v52, %v1875_v35 }
 0x28d   : > { %v2735_v4 = vpop.f32.mrb[70].mxu1 }
 0x28e   : > { %v1798_v43 = vpop.f32.mrb[71].mxu1  ;;  %v1879_v45 = vadd.f32 %v1878_v18, %v1877_v0  ;;  %v1882_v7 = vsel %vm1807_vm9, %v2735_v4, 0.0 }
 0x28f   : > { %v1880_v2 = vsel %vm1807_vm9, %v1798_v43, 0.0 }
 0x290   : > { %v1881_v16 = vadd.f32 %v1880_v2, %v1879_v45 }
 0x292   : > { %v1883_v38 = vadd.f32 %v1882_v7, %v1881_v16 }
 0x294   : > { %v1884_v21 = vrot.slane %v1883_v38, 4 }
 0x296   : > { %v1885_v29 = vadd.f32 %v1884_v21, %v1883_v38 }
 0x298   : > { %v1886_v8 = vrot.slane %v1885_v29, 2 }
 0x29a   : > { %v1887_v3 = vadd.f32 %v1886_v8, %v1885_v29 }
 0x29c   : > { %v1888_v30 = vrot.slane %v1887_v3, 1 }
 0x29e   : > { %v1889_v24 = vadd.f32 %v1888_v30, %v1887_v3 }
 0x2a0   : > { %v1898_v51 = vsel %vm1897_vm8, %v1848_v36, %v1889_v24 }
 0x2a1   : > { %v1899_v62 = vadd.f32 %v1898_v51, %v1896_v28 }
 0x2a3   : > { %1901 = vst.msk [vmem:[%s3911_s27] sm:$0x3] %vm1894_vm1, %v1899_v62 }
 0x2a4 PF: > { %s17_s23 = sadd.s32 1, %s2894_s23   ;;  %s4084_s21 = smov %s2890_s22 }
 0x2a5   : > { %p14_p6 = scmp.ge.s32.totalorder %s17_s23, 4   ;;  %s4085_s22 = smov %s4087_s24 }
 0x2a7   :  { %16 = sbr.rel (!%p14_p6) target bundleno = 2 (0x2), region = 88 }

</bundles_post_ra>
